<compile_context>
chip_gen: v7x
topology: tpu7x:2x2x1
jax: 0.10.0
libtpu: 0.0.40
codegen_flags: <defaults>
</compile_context>

<pallas_src>
import functools

import jax
import jax.numpy as jnp
from jax.experimental import pallas as pl
from jax.experimental.pallas import tpu as pltpu


# ----------------------------------------------------------------------------
# Fused Pallas kernel: cv1 -> cv2 -> AFF, one batch element per grid step.
# ----------------------------------------------------------------------------
def _fused_kernel(xq_ref, mask_ref, w1_ref, b1_ref, w2_ref, b2_ref,
                  wl1_ref, bl1_ref, wl2_ref, bl2_ref,
                  wg1_ref, bg1_ref, wg2_ref, bg2_ref,
                  o_ref, y1q_ref, *, H, W):
    # xq_ref : (C1, L)  flattened zero-padded image with extra margin of Mg lanes
    # mask_ref: (1, P)  1.0 at valid (interior) spatial positions, 0.0 at padding
    # w1_ref : (9, C_, C1) per-tap BN-folded cv1 weights, b1_ref: (C_, 1)
    # w2_ref : (9, C2, C_) per-tap BN-folded cv2 weights, b2_ref: (C2, 1)
    # wl*/wg*: 1x1-conv (BN-folded) weights (Cout, Cin), biases (Cout, 1)
    # o_ref  : (C2, P)  output in flat padded coordinates (interior is valid)
    # y1q_ref: (C_, L)  VMEM scratch staging masked y1 for cv2's halo reads
    Hp, Wp = H + 2, W + 2
    P = Hp * Wp
    Mg = Wp + 1                                   # margin so all tap slices are in-bounds
    offs = tuple((dy - 1) * Wp + (dx - 1) for dy in range(3) for dx in range(3))

    mask = mask_ref[...]                          # (1, P)

    def sigmoid(z):                               # stable, single EUP tanh
        return 0.5 * (jnp.tanh(0.5 * z) + 1.0)

    def conv3x3(src_ref, w_ref, b_ref):
        # 9 shifted lane-slices of the margin-padded flat buffer, accumulated dots.
        lo = Mg + offs[0]
        acc = jnp.dot(w_ref[0], src_ref[:, lo:lo + P],
                      preferred_element_type=jnp.float32)
        for t in range(1, 9):
            lo = Mg + offs[t]
            acc = acc + jnp.dot(w_ref[t], src_ref[:, lo:lo + P],
                                preferred_element_type=jnp.float32)
        return acc + b_ref[...]                   # (Cout, P)

    # --- cv1: Conv3x3 + BN + SiLU -------------------------------------------
    y1 = conv3x3(xq_ref, w1_ref, b1_ref)
    y1 = y1 * sigmoid(y1)                         # SiLU
    # stage masked y1 (zeros outside the valid image) for cv2's zero-padded conv
    y1q_ref[...] = jnp.zeros_like(y1q_ref)
    y1q_ref[:, Mg:Mg + P] = y1 * mask

    # --- cv2: Conv3x3 + BN + SiLU -------------------------------------------
    y2 = conv3x3(y1q_ref, w2_ref, b2_ref)
    y2 = y2 * sigmoid(y2)                         # residual = cv2(cv1(x))

    # --- AFF -----------------------------------------------------------------
    x = xq_ref[:, Mg:Mg + P]                      # original input (zero at padding)
    xa = (x + y2) * mask                          # exact zeros at padding

    # local attention: 1x1 conv -> ReLU -> 1x1 conv (BN folded)
    tl = jnp.maximum(
        jnp.dot(wl1_ref[...], xa, preferred_element_type=jnp.float32) + bl1_ref[...],
        0.0)
    xl = jnp.dot(wl2_ref[...], tl, preferred_element_type=jnp.float32) + bl2_ref[...]

    # global attention: average pool (valid positions only) -> MLP
    g = jnp.sum(xa, axis=1, keepdims=True) * (1.0 / (H * W))        # (C2, 1)
    tg = jnp.maximum(
        jnp.dot(wg1_ref[...], g, preferred_element_type=jnp.float32) + bg1_ref[...],
        0.0)
    xg = jnp.dot(wg2_ref[...], tg, preferred_element_type=jnp.float32) + bg2_ref[...]

    wei = sigmoid(xl + xg)                        # (C2, P), xg broadcasts over lanes
    # 2*x*wei + 2*r*(1-wei)  ==  2*(r + wei*(x - r))
    o_ref[...] = 2.0 * (y2 + wei * (x - y2))


# ----------------------------------------------------------------------------
# BN folding helpers (inference mode)
# ----------------------------------------------------------------------------
def _fold_bn(gamma, beta, mean, var, eps=1e-5):
    s = gamma / jnp.sqrt(var + eps)
    return s, beta - mean * s


def _fold_conv3x3_taps(w_oihw, bn_params):
    g, b, m, v = bn_params
    s, bias = _fold_bn(g, b, m, v)
    w = w_oihw * s[:, None, None, None]                       # (O, I, 3, 3)
    w_taps = jnp.transpose(w, (2, 3, 0, 1)).reshape(9, w.shape[0], w.shape[1])
    return w_taps, bias[:, None]                               # (9, O, I), (O, 1)


def _fold_conv1x1_lhs(w_oihw, b_conv, bn_params):
    g, b, m, v = bn_params
    s, bias = _fold_bn(g, b, m, v)
    w = w_oihw[:, :, 0, 0] * s[:, None]                        # (O, I)
    return w, (b_conv * s + bias)[:, None]                     # (O, 1)


# ----------------------------------------------------------------------------
# Full Bottleneck_AFF forward (NCHW in / NCHW out, like the PyTorch module)
# ----------------------------------------------------------------------------
def bottleneck_aff_forward(x_nchw, raw):
    x = x_nchw.astype(jnp.float32)
    N, C1, H, W = x.shape
    C_ = raw["cv1_w"].shape[0]
    C2 = raw["cv2_w"].shape[0]
    Ci = raw["l1_w"].shape[0]
    assert C1 == C2, "shortcut path requires c1 == c2"

    Hp, Wp = H + 2, W + 2
    P = Hp * Wp
    Mg = Wp + 1
    L = P + 2 * Mg

    # flatten the spatially zero-padded image and add the tap-slice margin
    xq = jnp.pad(x, ((0, 0), (0, 0), (1, 1), (1, 1))).reshape(N, C1, P)
    xq = jnp.pad(xq, ((0, 0), (0, 0), (Mg, Mg)))               # (N, C1, L)

    mask = jnp.zeros((Hp, Wp), jnp.float32).at[1:H + 1, 1:W + 1].set(1.0)
    mask = mask.reshape(1, P)

    w1, b1 = _fold_conv3x3_taps(raw["cv1_w"], raw["cv1_bn"])
    w2, b2 = _fold_conv3x3_taps(raw["cv2_w"], raw["cv2_bn"])
    wl1, bl1 = _fold_conv1x1_lhs(raw["l1_w"], raw["l1_b"], raw["l1_bn"])
    wl2, bl2 = _fold_conv1x1_lhs(raw["l2_w"], raw["l2_b"], raw["l2_bn"])
    wg1, bg1 = _fold_conv1x1_lhs(raw["g1_w"], raw["g1_b"], raw["g1_bn"])
    wg2, bg2 = _fold_conv1x1_lhs(raw["g2_w"], raw["g2_b"], raw["g2_bn"])

    kernel = functools.partial(_fused_kernel, H=H, W=W)

    def const2(shape):
        return pl.BlockSpec(shape, lambda n: (0, 0))

    def const3(shape):
        return pl.BlockSpec(shape, lambda n: (0, 0, 0))

    hw = H * W
    mm_flops = 2 * hw * (9 * C1 * C_ + 9 * C_ * C2 + 2 * Ci * C2)
    ew_flops = hw * (10 * C2 + 4 * C_)
    flops = N * (mm_flops + ew_flops)
    transcendentals = N * hw * (C_ + 2 * C2)
    bytes_accessed = 4 * (int(xq.size) + N * C2 * P
                          + int(w1.size) + int(w2.size) + 16 * C2 * Ci + P)

    out_flat = pl.pallas_call(
        kernel,
        out_shape=jax.ShapeDtypeStruct((N, C2, P), jnp.float32),
        grid=(N,),
        in_specs=[
            pl.BlockSpec((pl.Squeezed(), C1, L), lambda n: (n, 0, 0)),   # xq
            const2((1, P)),                                              # mask
            const3((9, C_, C1)), const2((C_, 1)),                        # cv1
            const3((9, C2, C_)), const2((C2, 1)),                        # cv2
            const2((Ci, C2)), const2((Ci, 1)),                           # local conv1
            const2((C2, Ci)), const2((C2, 1)),                           # local conv2
            const2((Ci, C2)), const2((Ci, 1)),                           # global conv1
            const2((C2, Ci)), const2((C2, 1)),                           # global conv2
        ],
        out_specs=pl.BlockSpec((pl.Squeezed(), C2, P), lambda n: (n, 0, 0)),
        scratch_shapes=[pltpu.VMEM((C_, L), jnp.float32)],
        compiler_params=pltpu.CompilerParams(
            dimension_semantics=("parallel",),
            vmem_limit_bytes=32 * 1024 * 1024),
        cost_estimate=pl.CostEstimate(
            flops=flops, transcendentals=transcendentals,
            bytes_accessed=bytes_accessed),
    )(xq, mask, w1, b1, w2, b2, wl1, bl1, wl2, bl2, wg1, bg1, wg2, bg2)

    # interior slice of the flat padded coords -> NCHW directly (no transpose)
    return out_flat.reshape(N, C2, Hp, Wp)[:, :, 1:H + 1, 1:W + 1]


# ----------------------------------------------------------------------------
# Parameter setup (deterministic, synthetic)
# ----------------------------------------------------------------------------
def init_params(key, c1=8, c2=8, e=0.5, r=4):
    """Shapes follow Bottleneck_AFF(c1, c2).__init__ with k=(3,3), g=1."""
    c_ = int(c2 * e)
    ci = c2 // r
    keys = iter(jax.random.split(key, 64))

    def u(shape, lo=-0.2, hi=0.2):
        return jax.random.uniform(next(keys), shape, jnp.float32, lo, hi)

    def bn(c):
        # (gamma, beta, running_mean, running_var) -- inference-mode stats
        return (u((c,), 0.8, 1.2), u((c,), -0.1, 0.1),
                u((c,), -0.1, 0.1), u((c,), 0.5, 1.5))

    return {
        "cv1_w": u((c_, c1, 3, 3)), "cv1_bn": bn(c_),
        "cv2_w": u((c2, c_, 3, 3)), "cv2_bn": bn(c2),
        # AFF local_att: Conv1x1(c2->ci, bias) BN ReLU Conv1x1(ci->c2, bias) BN
        "l1_w": u((ci, c2, 1, 1)), "l1_b": u((ci,)), "l1_bn": bn(ci),
        "l2_w": u((c2, ci, 1, 1)), "l2_b": u((c2,)), "l2_bn": bn(c2),
        # AFF global_att: same shapes, applied after global average pool
        "g1_w": u((ci, c2, 1, 1)), "g1_b": u((ci,)), "g1_bn": bn(ci),
        "g2_w": u((c2, ci, 1, 1)), "g2_b": u((c2,)), "g2_bn": bn(c2),
    }


# ----------------------------------------------------------------------------
# Pure-JAX reference (for correctness check)
# ----------------------------------------------------------------------------
def reference_forward(x_nchw, raw):
    x = jnp.transpose(x_nchw, (0, 2, 3, 1)).astype(jnp.float32)   # NHWC

    def conv(inp, w_oihw, pad):
        w = jnp.transpose(w_oihw, (2, 3, 1, 0))  # HWIO
        return jax.lax.conv_general_dilated(
            inp, w, (1, 1), ((pad, pad), (pad, pad)),
            dimension_numbers=("NHWC", "HWIO", "NHWC"))

    def bn(z, params):
        g, b, m, v = params
        return (z - m) / jnp.sqrt(v + 1e-5) * g + b

    silu = lambda z: z * jax.nn.sigmoid(z)

    y1 = silu(bn(conv(x, raw["cv1_w"], 1), raw["cv1_bn"]))
    y2 = silu(bn(conv(y1, raw["cv2_w"], 1), raw["cv2_bn"]))

    xa = x + y2
    xl = bn(conv(jnp.maximum(bn(conv(xa, raw["l1_w"], 0) + raw["l1_b"],
                                raw["l1_bn"]), 0.0),
                 raw["l2_w"], 0) + raw["l2_b"], raw["l2_bn"])
    g = jnp.mean(xa, axis=(1, 2), keepdims=True)
    xg = bn(conv(jnp.maximum(bn(conv(g, raw["g1_w"], 0) + raw["g1_b"],
                                raw["g1_bn"]), 0.0),
                 raw["g2_w"], 0) + raw["g2_b"], raw["g2_bn"])
    wei = jax.nn.sigmoid(xl + xg)
    xo = 2.0 * x * wei + 2.0 * y2 * (1.0 - wei)
    return jnp.transpose(xo, (0, 3, 1, 2))


# ----------------------------------------------------------------------------
if __name__ == "__main__":
    key = jax.random.PRNGKey(0)
    k_x, k_p = jax.random.split(key)

    N, C, H, W = 2, 8, 16, 16          # c1 = c2 = 8  -> shortcut path active
    x = jax.random.normal(k_x, (N, C, H, W), jnp.float32)
    raw = init_params(k_p, c1=C, c2=C)

    out = jax.block_until_ready(bottleneck_aff_forward(x, raw))
    ref = jax.block_until_ready(reference_forward(x, raw))

    assert out.shape == (N, C, H, W)
    err = float(jnp.max(jnp.abs(out - ref)))
    assert jnp.allclose(out, ref, atol=1e-3, rtol=1e-3), f"max abs err = {err}"

    print("KERNEL_OK")
</pallas_src>

<mosaic_0001>
module attributes {stable_mosaic.version = 11 : i64} {
  func.func @_fused_kernel(%arg0: i32, %arg1: memref<1x8x362xf32, #tpu.memory_space<vmem>>, %arg2: memref<1x324xf32, #tpu.memory_space<vmem>>, %arg3: memref<9x4x8xf32, #tpu.memory_space<vmem>>, %arg4: memref<4x1xf32, #tpu.memory_space<vmem>>, %arg5: memref<9x8x4xf32, #tpu.memory_space<vmem>>, %arg6: memref<8x1xf32, #tpu.memory_space<vmem>>, %arg7: memref<2x8xf32, #tpu.memory_space<vmem>>, %arg8: memref<2x1xf32, #tpu.memory_space<vmem>>, %arg9: memref<8x2xf32, #tpu.memory_space<vmem>>, %arg10: memref<8x1xf32, #tpu.memory_space<vmem>>, %arg11: memref<2x8xf32, #tpu.memory_space<vmem>>, %arg12: memref<2x1xf32, #tpu.memory_space<vmem>>, %arg13: memref<8x2xf32, #tpu.memory_space<vmem>>, %arg14: memref<8x1xf32, #tpu.memory_space<vmem>>, %arg15: memref<1x8x324xf32, #tpu.memory_space<vmem>>, %arg16: memref<4x362xf32, #tpu.memory_space<vmem>>) attributes {dimension_semantics = [#tpu.dimension_semantics<parallel>], iteration_bounds = array<i64: 2>, scalar_prefetch = 0 : i64, scratch_operands = 1 : i64, tpu.core_type = #tpu.core_type<tc>, window_params = [{transform_indices = @transform_0, window_bounds = array<i64: 1, 8, 362>}, {pipeline_mode = #tpu.pipeline_mode<synchronous>, transform_indices = @transform_1, window_bounds = array<i64: 1, 324>}, {pipeline_mode = #tpu.pipeline_mode<synchronous>, transform_indices = @transform_2, window_bounds = array<i64: 9, 4, 8>}, {pipeline_mode = #tpu.pipeline_mode<synchronous>, transform_indices = @transform_3, window_bounds = array<i64: 4, 1>}, {pipeline_mode = #tpu.pipeline_mode<synchronous>, transform_indices = @transform_4, window_bounds = array<i64: 9, 8, 4>}, {pipeline_mode = #tpu.pipeline_mode<synchronous>, transform_indices = @transform_5, window_bounds = array<i64: 8, 1>}, {pipeline_mode = #tpu.pipeline_mode<synchronous>, transform_indices = @transform_6, window_bounds = array<i64: 2, 8>}, {pipeline_mode = #tpu.pipeline_mode<synchronous>, transform_indices = @transform_7, window_bounds = array<i64: 2, 1>}, {pipeline_mode = #tpu.pipeline_mode<synchronous>, transform_indices = @transform_8, window_bounds = array<i64: 8, 2>}, {pipeline_mode = #tpu.pipeline_mode<synchronous>, transform_indices = @transform_9, window_bounds = array<i64: 8, 1>}, {pipeline_mode = #tpu.pipeline_mode<synchronous>, transform_indices = @transform_10, window_bounds = array<i64: 2, 8>}, {pipeline_mode = #tpu.pipeline_mode<synchronous>, transform_indices = @transform_11, window_bounds = array<i64: 2, 1>}, {pipeline_mode = #tpu.pipeline_mode<synchronous>, transform_indices = @transform_12, window_bounds = array<i64: 8, 2>}, {pipeline_mode = #tpu.pipeline_mode<synchronous>, transform_indices = @transform_13, window_bounds = array<i64: 8, 1>}, {transform_indices = @transform_14, window_bounds = array<i64: 1, 8, 324>}]} {
    %c0 = arith.constant 0 : index
    %c0_0 = arith.constant 0 : index
    %0 = vector.load %arg2[%c0, %c0_0] : memref<1x324xf32, #tpu.memory_space<vmem>>, vector<1x324xf32>
    %c0_1 = arith.constant 0 : index
    %c0_2 = arith.constant 0 : index
    %c0_3 = arith.constant 0 : index
    %1 = vector.load %arg3[%c0_1, %c0_2, %c0_3] : memref<9x4x8xf32, #tpu.memory_space<vmem>>, vector<1x4x8xf32>
    %2 = vector.shape_cast %1 : vector<1x4x8xf32> to vector<4x8xf32>
    %c0_4 = arith.constant 0 : index
    %c0_5 = arith.constant 0 : index
    %c0_6 = arith.constant 0 : index
    %3 = vector.load %arg1[%c0_4, %c0_5, %c0_6] : memref<1x8x362xf32, #tpu.memory_space<vmem>>, vector<1x8x324xf32>
    %4 = vector.shape_cast %3 : vector<1x8x324xf32> to vector<8x324xf32>
    %cst = arith.constant dense<0.000000e+00> : vector<4x324xf32>
    %5 = tpu.matmul %2, %4, %cst {dimension_numbers = #tpu.dot_dimension_numbers<[1], [0], [0], [1], [0, 0, 1, 1], [], []>} : vector<4x8xf32>, vector<8x324xf32>, vector<4x324xf32> -> vector<4x324xf32>
    %c1 = arith.constant 1 : index
    %c0_7 = arith.constant 0 : index
    %c0_8 = arith.constant 0 : index
    %6 = vector.load %arg3[%c1, %c0_7, %c0_8] : memref<9x4x8xf32, #tpu.memory_space<vmem>>, vector<1x4x8xf32>
    %7 = vector.shape_cast %6 : vector<1x4x8xf32> to vector<4x8xf32>
    %c0_9 = arith.constant 0 : index
    %c0_10 = arith.constant 0 : index
    %c1_11 = arith.constant 1 : index
    %8 = vector.load %arg1[%c0_9, %c0_10, %c1_11] : memref<1x8x362xf32, #tpu.memory_space<vmem>>, vector<1x8x324xf32>
    %9 = vector.shape_cast %8 : vector<1x8x324xf32> to vector<8x324xf32>
    %cst_12 = arith.constant dense<0.000000e+00> : vector<4x324xf32>
    %10 = tpu.matmul %7, %9, %cst_12 {dimension_numbers = #tpu.dot_dimension_numbers<[1], [0], [0], [1], [0, 0, 1, 1], [], []>} : vector<4x8xf32>, vector<8x324xf32>, vector<4x324xf32> -> vector<4x324xf32>
    %11 = arith.addf %5, %10 : vector<4x324xf32>
    %c2 = arith.constant 2 : index
    %c0_13 = arith.constant 0 : index
    %c0_14 = arith.constant 0 : index
    %12 = vector.load %arg3[%c2, %c0_13, %c0_14] : memref<9x4x8xf32, #tpu.memory_space<vmem>>, vector<1x4x8xf32>
    %13 = vector.shape_cast %12 : vector<1x4x8xf32> to vector<4x8xf32>
    %c0_15 = arith.constant 0 : index
    %c0_16 = arith.constant 0 : index
    %c2_17 = arith.constant 2 : index
    %14 = vector.load %arg1[%c0_15, %c0_16, %c2_17] : memref<1x8x362xf32, #tpu.memory_space<vmem>>, vector<1x8x324xf32>
    %15 = vector.shape_cast %14 : vector<1x8x324xf32> to vector<8x324xf32>
    %cst_18 = arith.constant dense<0.000000e+00> : vector<4x324xf32>
    %16 = tpu.matmul %13, %15, %cst_18 {dimension_numbers = #tpu.dot_dimension_numbers<[1], [0], [0], [1], [0, 0, 1, 1], [], []>} : vector<4x8xf32>, vector<8x324xf32>, vector<4x324xf32> -> vector<4x324xf32>
    %17 = arith.addf %11, %16 : vector<4x324xf32>
    %c3 = arith.constant 3 : index
    %c0_19 = arith.constant 0 : index
    %c0_20 = arith.constant 0 : index
    %18 = vector.load %arg3[%c3, %c0_19, %c0_20] : memref<9x4x8xf32, #tpu.memory_space<vmem>>, vector<1x4x8xf32>
    %19 = vector.shape_cast %18 : vector<1x4x8xf32> to vector<4x8xf32>
    %c0_21 = arith.constant 0 : index
    %c0_22 = arith.constant 0 : index
    %c18 = arith.constant 18 : index
    %20 = vector.load %arg1[%c0_21, %c0_22, %c18] : memref<1x8x362xf32, #tpu.memory_space<vmem>>, vector<1x8x324xf32>
    %21 = vector.shape_cast %20 : vector<1x8x324xf32> to vector<8x324xf32>
    %cst_23 = arith.constant dense<0.000000e+00> : vector<4x324xf32>
    %22 = tpu.matmul %19, %21, %cst_23 {dimension_numbers = #tpu.dot_dimension_numbers<[1], [0], [0], [1], [0, 0, 1, 1], [], []>} : vector<4x8xf32>, vector<8x324xf32>, vector<4x324xf32> -> vector<4x324xf32>
    %23 = arith.addf %17, %22 : vector<4x324xf32>
    %c4 = arith.constant 4 : index
    %c0_24 = arith.constant 0 : index
    %c0_25 = arith.constant 0 : index
    %24 = vector.load %arg3[%c4, %c0_24, %c0_25] : memref<9x4x8xf32, #tpu.memory_space<vmem>>, vector<1x4x8xf32>
    %25 = vector.shape_cast %24 : vector<1x4x8xf32> to vector<4x8xf32>
    %c0_26 = arith.constant 0 : index
    %c0_27 = arith.constant 0 : index
    %c19 = arith.constant 19 : index
    %26 = vector.load %arg1[%c0_26, %c0_27, %c19] : memref<1x8x362xf32, #tpu.memory_space<vmem>>, vector<1x8x324xf32>
    %27 = vector.shape_cast %26 : vector<1x8x324xf32> to vector<8x324xf32>
    %cst_28 = arith.constant dense<0.000000e+00> : vector<4x324xf32>
    %28 = tpu.matmul %25, %27, %cst_28 {dimension_numbers = #tpu.dot_dimension_numbers<[1], [0], [0], [1], [0, 0, 1, 1], [], []>} : vector<4x8xf32>, vector<8x324xf32>, vector<4x324xf32> -> vector<4x324xf32>
    %29 = arith.addf %23, %28 : vector<4x324xf32>
    %c5 = arith.constant 5 : index
    %c0_29 = arith.constant 0 : index
    %c0_30 = arith.constant 0 : index
    %30 = vector.load %arg3[%c5, %c0_29, %c0_30] : memref<9x4x8xf32, #tpu.memory_space<vmem>>, vector<1x4x8xf32>
    %31 = vector.shape_cast %30 : vector<1x4x8xf32> to vector<4x8xf32>
    %c0_31 = arith.constant 0 : index
    %c0_32 = arith.constant 0 : index
    %c20 = arith.constant 20 : index
    %32 = vector.load %arg1[%c0_31, %c0_32, %c20] : memref<1x8x362xf32, #tpu.memory_space<vmem>>, vector<1x8x324xf32>
    %33 = vector.shape_cast %32 : vector<1x8x324xf32> to vector<8x324xf32>
    %cst_33 = arith.constant dense<0.000000e+00> : vector<4x324xf32>
    %34 = tpu.matmul %31, %33, %cst_33 {dimension_numbers = #tpu.dot_dimension_numbers<[1], [0], [0], [1], [0, 0, 1, 1], [], []>} : vector<4x8xf32>, vector<8x324xf32>, vector<4x324xf32> -> vector<4x324xf32>
    %35 = arith.addf %29, %34 : vector<4x324xf32>
    %c6 = arith.constant 6 : index
    %c0_34 = arith.constant 0 : index
    %c0_35 = arith.constant 0 : index
    %36 = vector.load %arg3[%c6, %c0_34, %c0_35] : memref<9x4x8xf32, #tpu.memory_space<vmem>>, vector<1x4x8xf32>
    %37 = vector.shape_cast %36 : vector<1x4x8xf32> to vector<4x8xf32>
    %c0_36 = arith.constant 0 : index
    %c0_37 = arith.constant 0 : index
    %c36 = arith.constant 36 : index
    %38 = vector.load %arg1[%c0_36, %c0_37, %c36] : memref<1x8x362xf32, #tpu.memory_space<vmem>>, vector<1x8x324xf32>
    %39 = vector.shape_cast %38 : vector<1x8x324xf32> to vector<8x324xf32>
    %cst_38 = arith.constant dense<0.000000e+00> : vector<4x324xf32>
    %40 = tpu.matmul %37, %39, %cst_38 {dimension_numbers = #tpu.dot_dimension_numbers<[1], [0], [0], [1], [0, 0, 1, 1], [], []>} : vector<4x8xf32>, vector<8x324xf32>, vector<4x324xf32> -> vector<4x324xf32>
    %41 = arith.addf %35, %40 : vector<4x324xf32>
    %c7 = arith.constant 7 : index
    %c0_39 = arith.constant 0 : index
    %c0_40 = arith.constant 0 : index
    %42 = vector.load %arg3[%c7, %c0_39, %c0_40] : memref<9x4x8xf32, #tpu.memory_space<vmem>>, vector<1x4x8xf32>
    %43 = vector.shape_cast %42 : vector<1x4x8xf32> to vector<4x8xf32>
    %c0_41 = arith.constant 0 : index
    %c0_42 = arith.constant 0 : index
    %c37 = arith.constant 37 : index
    %44 = vector.load %arg1[%c0_41, %c0_42, %c37] : memref<1x8x362xf32, #tpu.memory_space<vmem>>, vector<1x8x324xf32>
    %45 = vector.shape_cast %44 : vector<1x8x324xf32> to vector<8x324xf32>
    %cst_43 = arith.constant dense<0.000000e+00> : vector<4x324xf32>
    %46 = tpu.matmul %43, %45, %cst_43 {dimension_numbers = #tpu.dot_dimension_numbers<[1], [0], [0], [1], [0, 0, 1, 1], [], []>} : vector<4x8xf32>, vector<8x324xf32>, vector<4x324xf32> -> vector<4x324xf32>
    %47 = arith.addf %41, %46 : vector<4x324xf32>
    %c8 = arith.constant 8 : index
    %c0_44 = arith.constant 0 : index
    %c0_45 = arith.constant 0 : index
    %48 = vector.load %arg3[%c8, %c0_44, %c0_45] : memref<9x4x8xf32, #tpu.memory_space<vmem>>, vector<1x4x8xf32>
    %49 = vector.shape_cast %48 : vector<1x4x8xf32> to vector<4x8xf32>
    %c0_46 = arith.constant 0 : index
    %c0_47 = arith.constant 0 : index
    %c38 = arith.constant 38 : index
    %50 = vector.load %arg1[%c0_46, %c0_47, %c38] : memref<1x8x362xf32, #tpu.memory_space<vmem>>, vector<1x8x324xf32>
    %51 = vector.shape_cast %50 : vector<1x8x324xf32> to vector<8x324xf32>
    %cst_48 = arith.constant dense<0.000000e+00> : vector<4x324xf32>
    %52 = tpu.matmul %49, %51, %cst_48 {dimension_numbers = #tpu.dot_dimension_numbers<[1], [0], [0], [1], [0, 0, 1, 1], [], []>} : vector<4x8xf32>, vector<8x324xf32>, vector<4x324xf32> -> vector<4x324xf32>
    %53 = arith.addf %47, %52 : vector<4x324xf32>
    %c0_49 = arith.constant 0 : index
    %c0_50 = arith.constant 0 : index
    %54 = vector.load %arg4[%c0_49, %c0_50] : memref<4x1xf32, #tpu.memory_space<vmem>>, vector<4x1xf32>
    %55 = vector.broadcast %54 : vector<4x1xf32> to vector<4x324xf32>
    %56 = arith.addf %53, %55 : vector<4x324xf32>
    %cst_51 = arith.constant 5.000000e-01 : f32
    %57 = vector.broadcast %cst_51 : f32 to vector<4x324xf32>
    %58 = arith.mulf %57, %56 : vector<4x324xf32>
    %59 = math.tanh %58 : vector<4x324xf32>
    %cst_52 = arith.constant 1.000000e+00 : f32
    %60 = vector.broadcast %cst_52 : f32 to vector<4x324xf32>
    %61 = arith.addf %59, %60 : vector<4x324xf32>
    %cst_53 = arith.constant 5.000000e-01 : f32
    %62 = vector.broadcast %cst_53 : f32 to vector<4x324xf32>
    %63 = arith.mulf %62, %61 : vector<4x324xf32>
    %64 = arith.mulf %56, %63 : vector<4x324xf32>
    %cst_54 = arith.constant 0.000000e+00 : f32
    %65 = vector.broadcast %cst_54 : f32 to vector<4x362xf32>
    %c0_55 = arith.constant 0 : index
    %c0_56 = arith.constant 0 : index
    %66 = vector.load %arg16[%c0_55, %c0_56] : memref<4x362xf32, #tpu.memory_space<vmem>>, vector<4x362xf32>
    tpu.vector_store %arg16[%c0_55, %c0_56], %65 {strides = array<i32>} : memref<4x362xf32, #tpu.memory_space<vmem>>, vector<4x362xf32>,
    %67 = vector.broadcast %0 : vector<1x324xf32> to vector<4x324xf32>
    %68 = arith.mulf %64, %67 : vector<4x324xf32>
    %c0_57 = arith.constant 0 : index
    %c19_58 = arith.constant 19 : index
    %69 = vector.load %arg16[%c0_57, %c19_58] : memref<4x362xf32, #tpu.memory_space<vmem>>, vector<4x324xf32>
    tpu.vector_store %arg16[%c0_57, %c19_58], %68 {strides = array<i32>} : memref<4x362xf32, #tpu.memory_space<vmem>>, vector<4x324xf32>,
    %c0_59 = arith.constant 0 : index
    %c0_60 = arith.constant 0 : index
    %c0_61 = arith.constant 0 : index
    %70 = vector.load %arg5[%c0_59, %c0_60, %c0_61] : memref<9x8x4xf32, #tpu.memory_space<vmem>>, vector<1x8x4xf32>
    %71 = vector.shape_cast %70 : vector<1x8x4xf32> to vector<8x4xf32>
    %c0_62 = arith.constant 0 : index
    %c0_63 = arith.constant 0 : index
    %72 = vector.load %arg16[%c0_62, %c0_63] : memref<4x362xf32, #tpu.memory_space<vmem>>, vector<4x324xf32>
    %cst_64 = arith.constant dense<0.000000e+00> : vector<8x324xf32>
    %73 = tpu.matmul %71, %72, %cst_64 {dimension_numbers = #tpu.dot_dimension_numbers<[1], [0], [0], [1], [0, 0, 1, 1], [], []>} : vector<8x4xf32>, vector<4x324xf32>, vector<8x324xf32> -> vector<8x324xf32>
    %c1_65 = arith.constant 1 : index
    %c0_66 = arith.constant 0 : index
    %c0_67 = arith.constant 0 : index
    %74 = vector.load %arg5[%c1_65, %c0_66, %c0_67] : memref<9x8x4xf32, #tpu.memory_space<vmem>>, vector<1x8x4xf32>
    %75 = vector.shape_cast %74 : vector<1x8x4xf32> to vector<8x4xf32>
    %c0_68 = arith.constant 0 : index
    %c1_69 = arith.constant 1 : index
    %76 = vector.load %arg16[%c0_68, %c1_69] : memref<4x362xf32, #tpu.memory_space<vmem>>, vector<4x324xf32>
    %cst_70 = arith.constant dense<0.000000e+00> : vector<8x324xf32>
    %77 = tpu.matmul %75, %76, %cst_70 {dimension_numbers = #tpu.dot_dimension_numbers<[1], [0], [0], [1], [0, 0, 1, 1], [], []>} : vector<8x4xf32>, vector<4x324xf32>, vector<8x324xf32> -> vector<8x324xf32>
    %78 = arith.addf %73, %77 : vector<8x324xf32>
    %c2_71 = arith.constant 2 : index
    %c0_72 = arith.constant 0 : index
    %c0_73 = arith.constant 0 : index
    %79 = vector.load %arg5[%c2_71, %c0_72, %c0_73] : memref<9x8x4xf32, #tpu.memory_space<vmem>>, vector<1x8x4xf32>
    %80 = vector.shape_cast %79 : vector<1x8x4xf32> to vector<8x4xf32>
    %c0_74 = arith.constant 0 : index
    %c2_75 = arith.constant 2 : index
    %81 = vector.load %arg16[%c0_74, %c2_75] : memref<4x362xf32, #tpu.memory_space<vmem>>, vector<4x324xf32>
    %cst_76 = arith.constant dense<0.000000e+00> : vector<8x324xf32>
    %82 = tpu.matmul %80, %81, %cst_76 {dimension_numbers = #tpu.dot_dimension_numbers<[1], [0], [0], [1], [0, 0, 1, 1], [], []>} : vector<8x4xf32>, vector<4x324xf32>, vector<8x324xf32> -> vector<8x324xf32>
    %83 = arith.addf %78, %82 : vector<8x324xf32>
    %c3_77 = arith.constant 3 : index
    %c0_78 = arith.constant 0 : index
    %c0_79 = arith.constant 0 : index
    %84 = vector.load %arg5[%c3_77, %c0_78, %c0_79] : memref<9x8x4xf32, #tpu.memory_space<vmem>>, vector<1x8x4xf32>
    %85 = vector.shape_cast %84 : vector<1x8x4xf32> to vector<8x4xf32>
    %c0_80 = arith.constant 0 : index
    %c18_81 = arith.constant 18 : index
    %86 = vector.load %arg16[%c0_80, %c18_81] : memref<4x362xf32, #tpu.memory_space<vmem>>, vector<4x324xf32>
    %cst_82 = arith.constant dense<0.000000e+00> : vector<8x324xf32>
    %87 = tpu.matmul %85, %86, %cst_82 {dimension_numbers = #tpu.dot_dimension_numbers<[1], [0], [0], [1], [0, 0, 1, 1], [], []>} : vector<8x4xf32>, vector<4x324xf32>, vector<8x324xf32> -> vector<8x324xf32>
    %88 = arith.addf %83, %87 : vector<8x324xf32>
    %c4_83 = arith.constant 4 : index
    %c0_84 = arith.constant 0 : index
    %c0_85 = arith.constant 0 : index
    %89 = vector.load %arg5[%c4_83, %c0_84, %c0_85] : memref<9x8x4xf32, #tpu.memory_space<vmem>>, vector<1x8x4xf32>
    %90 = vector.shape_cast %89 : vector<1x8x4xf32> to vector<8x4xf32>
    %c0_86 = arith.constant 0 : index
    %c19_87 = arith.constant 19 : index
    %91 = vector.load %arg16[%c0_86, %c19_87] : memref<4x362xf32, #tpu.memory_space<vmem>>, vector<4x324xf32>
    %cst_88 = arith.constant dense<0.000000e+00> : vector<8x324xf32>
    %92 = tpu.matmul %90, %91, %cst_88 {dimension_numbers = #tpu.dot_dimension_numbers<[1], [0], [0], [1], [0, 0, 1, 1], [], []>} : vector<8x4xf32>, vector<4x324xf32>, vector<8x324xf32> -> vector<8x324xf32>
    %93 = arith.addf %88, %92 : vector<8x324xf32>
    %c5_89 = arith.constant 5 : index
    %c0_90 = arith.constant 0 : index
    %c0_91 = arith.constant 0 : index
    %94 = vector.load %arg5[%c5_89, %c0_90, %c0_91] : memref<9x8x4xf32, #tpu.memory_space<vmem>>, vector<1x8x4xf32>
    %95 = vector.shape_cast %94 : vector<1x8x4xf32> to vector<8x4xf32>
    %c0_92 = arith.constant 0 : index
    %c20_93 = arith.constant 20 : index
    %96 = vector.load %arg16[%c0_92, %c20_93] : memref<4x362xf32, #tpu.memory_space<vmem>>, vector<4x324xf32>
    %cst_94 = arith.constant dense<0.000000e+00> : vector<8x324xf32>
    %97 = tpu.matmul %95, %96, %cst_94 {dimension_numbers = #tpu.dot_dimension_numbers<[1], [0], [0], [1], [0, 0, 1, 1], [], []>} : vector<8x4xf32>, vector<4x324xf32>, vector<8x324xf32> -> vector<8x324xf32>
    %98 = arith.addf %93, %97 : vector<8x324xf32>
    %c6_95 = arith.constant 6 : index
    %c0_96 = arith.constant 0 : index
    %c0_97 = arith.constant 0 : index
    %99 = vector.load %arg5[%c6_95, %c0_96, %c0_97] : memref<9x8x4xf32, #tpu.memory_space<vmem>>, vector<1x8x4xf32>
    %100 = vector.shape_cast %99 : vector<1x8x4xf32> to vector<8x4xf32>
    %c0_98 = arith.constant 0 : index
    %c36_99 = arith.constant 36 : index
    %101 = vector.load %arg16[%c0_98, %c36_99] : memref<4x362xf32, #tpu.memory_space<vmem>>, vector<4x324xf32>
    %cst_100 = arith.constant dense<0.000000e+00> : vector<8x324xf32>
    %102 = tpu.matmul %100, %101, %cst_100 {dimension_numbers = #tpu.dot_dimension_numbers<[1], [0], [0], [1], [0, 0, 1, 1], [], []>} : vector<8x4xf32>, vector<4x324xf32>, vector<8x324xf32> -> vector<8x324xf32>
    %103 = arith.addf %98, %102 : vector<8x324xf32>
    %c7_101 = arith.constant 7 : index
    %c0_102 = arith.constant 0 : index
    %c0_103 = arith.constant 0 : index
    %104 = vector.load %arg5[%c7_101, %c0_102, %c0_103] : memref<9x8x4xf32, #tpu.memory_space<vmem>>, vector<1x8x4xf32>
    %105 = vector.shape_cast %104 : vector<1x8x4xf32> to vector<8x4xf32>
    %c0_104 = arith.constant 0 : index
    %c37_105 = arith.constant 37 : index
    %106 = vector.load %arg16[%c0_104, %c37_105] : memref<4x362xf32, #tpu.memory_space<vmem>>, vector<4x324xf32>
    %cst_106 = arith.constant dense<0.000000e+00> : vector<8x324xf32>
    %107 = tpu.matmul %105, %106, %cst_106 {dimension_numbers = #tpu.dot_dimension_numbers<[1], [0], [0], [1], [0, 0, 1, 1], [], []>} : vector<8x4xf32>, vector<4x324xf32>, vector<8x324xf32> -> vector<8x324xf32>
    %108 = arith.addf %103, %107 : vector<8x324xf32>
    %c8_107 = arith.constant 8 : index
    %c0_108 = arith.constant 0 : index
    %c0_109 = arith.constant 0 : index
    %109 = vector.load %arg5[%c8_107, %c0_108, %c0_109] : memref<9x8x4xf32, #tpu.memory_space<vmem>>, vector<1x8x4xf32>
    %110 = vector.shape_cast %109 : vector<1x8x4xf32> to vector<8x4xf32>
    %c0_110 = arith.constant 0 : index
    %c38_111 = arith.constant 38 : index
    %111 = vector.load %arg16[%c0_110, %c38_111] : memref<4x362xf32, #tpu.memory_space<vmem>>, vector<4x324xf32>
    %cst_112 = arith.constant dense<0.000000e+00> : vector<8x324xf32>
    %112 = tpu.matmul %110, %111, %cst_112 {dimension_numbers = #tpu.dot_dimension_numbers<[1], [0], [0], [1], [0, 0, 1, 1], [], []>} : vector<8x4xf32>, vector<4x324xf32>, vector<8x324xf32> -> vector<8x324xf32>
    %113 = arith.addf %108, %112 : vector<8x324xf32>
    %c0_113 = arith.constant 0 : index
    %c0_114 = arith.constant 0 : index
    %114 = vector.load %arg6[%c0_113, %c0_114] : memref<8x1xf32, #tpu.memory_space<vmem>>, vector<8x1xf32>
    %115 = vector.broadcast %114 : vector<8x1xf32> to vector<8x324xf32>
    %116 = arith.addf %113, %115 : vector<8x324xf32>
    %cst_115 = arith.constant 5.000000e-01 : f32
    %117 = vector.broadcast %cst_115 : f32 to vector<8x324xf32>
    %118 = arith.mulf %117, %116 : vector<8x324xf32>
    %119 = math.tanh %118 : vector<8x324xf32>
    %cst_116 = arith.constant 1.000000e+00 : f32
    %120 = vector.broadcast %cst_116 : f32 to vector<8x324xf32>
    %121 = arith.addf %119, %120 : vector<8x324xf32>
    %cst_117 = arith.constant 5.000000e-01 : f32
    %122 = vector.broadcast %cst_117 : f32 to vector<8x324xf32>
    %123 = arith.mulf %122, %121 : vector<8x324xf32>
    %124 = arith.mulf %116, %123 : vector<8x324xf32>
    %c0_118 = arith.constant 0 : index
    %c0_119 = arith.constant 0 : index
    %c19_120 = arith.constant 19 : index
    %125 = vector.load %arg1[%c0_118, %c0_119, %c19_120] : memref<1x8x362xf32, #tpu.memory_space<vmem>>, vector<1x8x324xf32>
    %126 = vector.shape_cast %125 : vector<1x8x324xf32> to vector<8x324xf32>
    %127 = arith.addf %126, %124 : vector<8x324xf32>
    %128 = vector.broadcast %0 : vector<1x324xf32> to vector<8x324xf32>
    %129 = arith.mulf %127, %128 : vector<8x324xf32>
    %c0_121 = arith.constant 0 : index
    %c0_122 = arith.constant 0 : index
    %130 = vector.load %arg7[%c0_121, %c0_122] : memref<2x8xf32, #tpu.memory_space<vmem>>, vector<2x8xf32>
    %cst_123 = arith.constant dense<0.000000e+00> : vector<2x324xf32>
    %131 = tpu.matmul %130, %129, %cst_123 {dimension_numbers = #tpu.dot_dimension_numbers<[1], [0], [0], [1], [0, 0, 1, 1], [], []>} : vector<2x8xf32>, vector<8x324xf32>, vector<2x324xf32> -> vector<2x324xf32>
    %c0_124 = arith.constant 0 : index
    %c0_125 = arith.constant 0 : index
    %132 = vector.load %arg8[%c0_124, %c0_125] : memref<2x1xf32, #tpu.memory_space<vmem>>, vector<2x1xf32>
    %133 = vector.broadcast %132 : vector<2x1xf32> to vector<2x324xf32>
    %134 = arith.addf %131, %133 : vector<2x324xf32>
    %cst_126 = arith.constant 0.000000e+00 : f32
    %135 = vector.broadcast %cst_126 : f32 to vector<2x324xf32>
    %136 = arith.maximumf %134, %135 : vector<2x324xf32>
    %c0_127 = arith.constant 0 : index
    %c0_128 = arith.constant 0 : index
    %137 = vector.load %arg9[%c0_127, %c0_128] : memref<8x2xf32, #tpu.memory_space<vmem>>, vector<8x2xf32>
    %cst_129 = arith.constant dense<0.000000e+00> : vector<8x324xf32>
    %138 = tpu.matmul %137, %136, %cst_129 {dimension_numbers = #tpu.dot_dimension_numbers<[1], [0], [0], [1], [0, 0, 1, 1], [], []>} : vector<8x2xf32>, vector<2x324xf32>, vector<8x324xf32> -> vector<8x324xf32>
    %c0_130 = arith.constant 0 : index
    %c0_131 = arith.constant 0 : index
    %139 = vector.load %arg10[%c0_130, %c0_131] : memref<8x1xf32, #tpu.memory_space<vmem>>, vector<8x1xf32>
    %140 = vector.broadcast %139 : vector<8x1xf32> to vector<8x324xf32>
    %141 = arith.addf %138, %140 : vector<8x324xf32>
    %cst_132 = arith.constant dense<0.000000e+00> : vector<8xf32>
    %142 = vector.multi_reduction <add>, %129, %cst_132 [1] : vector<8x324xf32> to vector<8xf32>
    %143 = vector.shape_cast %142 : vector<8xf32> to vector<8x1xf32>
    %cst_133 = arith.constant 3.906250e-03 : f32
    %144 = vector.broadcast %cst_133 : f32 to vector<8x1xf32>
    %145 = arith.mulf %143, %144 : vector<8x1xf32>
    %c0_134 = arith.constant 0 : index
    %c0_135 = arith.constant 0 : index
    %146 = vector.load %arg11[%c0_134, %c0_135] : memref<2x8xf32, #tpu.memory_space<vmem>>, vector<2x8xf32>
    %cst_136 = arith.constant dense<0.000000e+00> : vector<2x1xf32>
    %147 = tpu.matmul %146, %145, %cst_136 {dimension_numbers = #tpu.dot_dimension_numbers<[1], [0], [0], [1], [0, 0, 1, 1], [], []>} : vector<2x8xf32>, vector<8x1xf32>, vector<2x1xf32> -> vector<2x1xf32>
    %c0_137 = arith.constant 0 : index
    %c0_138 = arith.constant 0 : index
    %148 = vector.load %arg12[%c0_137, %c0_138] : memref<2x1xf32, #tpu.memory_space<vmem>>, vector<2x1xf32>
    %149 = arith.addf %147, %148 : vector<2x1xf32>
    %cst_139 = arith.constant 0.000000e+00 : f32
    %150 = vector.broadcast %cst_139 : f32 to vector<2x1xf32>
    %151 = arith.maximumf %149, %150 : vector<2x1xf32>
    %c0_140 = arith.constant 0 : index
    %c0_141 = arith.constant 0 : index
    %152 = vector.load %arg13[%c0_140, %c0_141] : memref<8x2xf32, #tpu.memory_space<vmem>>, vector<8x2xf32>
    %cst_142 = arith.constant dense<0.000000e+00> : vector<8x1xf32>
    %153 = tpu.matmul %152, %151, %cst_142 {dimension_numbers = #tpu.dot_dimension_numbers<[1], [0], [0], [1], [0, 0, 1, 1], [], []>} : vector<8x2xf32>, vector<2x1xf32>, vector<8x1xf32> -> vector<8x1xf32>
    %c0_143 = arith.constant 0 : index
    %c0_144 = arith.constant 0 : index
    %154 = vector.load %arg14[%c0_143, %c0_144] : memref<8x1xf32, #tpu.memory_space<vmem>>, vector<8x1xf32>
    %155 = arith.addf %153, %154 : vector<8x1xf32>
    %156 = vector.broadcast %155 : vector<8x1xf32> to vector<8x324xf32>
    %157 = arith.addf %141, %156 : vector<8x324xf32>
    %cst_145 = arith.constant 5.000000e-01 : f32
    %158 = vector.broadcast %cst_145 : f32 to vector<8x324xf32>
    %159 = arith.mulf %158, %157 : vector<8x324xf32>
    %160 = math.tanh %159 : vector<8x324xf32>
    %cst_146 = arith.constant 1.000000e+00 : f32
    %161 = vector.broadcast %cst_146 : f32 to vector<8x324xf32>
    %162 = arith.addf %160, %161 : vector<8x324xf32>
    %cst_147 = arith.constant 5.000000e-01 : f32
    %163 = vector.broadcast %cst_147 : f32 to vector<8x324xf32>
    %164 = arith.mulf %163, %162 : vector<8x324xf32>
    %165 = arith.subf %126, %124 : vector<8x324xf32>
    %166 = arith.mulf %164, %165 : vector<8x324xf32>
    %167 = arith.addf %124, %166 : vector<8x324xf32>
    %cst_148 = arith.constant 2.000000e+00 : f32
    %168 = vector.broadcast %cst_148 : f32 to vector<8x324xf32>
    %169 = arith.mulf %168, %167 : vector<8x324xf32>
    %c0_149 = arith.constant 0 : index
    %c0_150 = arith.constant 0 : index
    %c0_151 = arith.constant 0 : index
    %170 = vector.load %arg15[%c0_149, %c0_150, %c0_151] : memref<1x8x324xf32, #tpu.memory_space<vmem>>, vector<1x8x324xf32>
    %171 = vector.shape_cast %170 : vector<1x8x324xf32> to vector<8x324xf32>
    %172 = vector.shape_cast %169 : vector<8x324xf32> to vector<1x8x324xf32>
    tpu.vector_store %arg15[%c0_149, %c0_150, %c0_151], %172 {strides = array<i32>} : memref<1x8x324xf32, #tpu.memory_space<vmem>>, vector<1x8x324xf32>,
    return
  }
  func.func @transform_0(%arg0: i32) -> (i32, i32, i32) {
    %c0_i32 = arith.constant 0 : i32
    %c0_i32_0 = arith.constant 0 : i32
    %c0_i32_1 = arith.constant 0 : i32
    return %arg0, %c0_i32, %c0_i32_0 : i32, i32, i32
  }
  func.func @transform_1(%arg0: i32) -> (i32, i32) {
    %c0_i32 = arith.constant 0 : i32
    %c0_i32_0 = arith.constant 0 : i32
    %c0_i32_1 = arith.constant 0 : i32
    return %c0_i32, %c0_i32_0 : i32, i32
  }
  func.func @transform_2(%arg0: i32) -> (i32, i32, i32) {
    %c0_i32 = arith.constant 0 : i32
    %c0_i32_0 = arith.constant 0 : i32
    %c0_i32_1 = arith.constant 0 : i32
    %c0_i32_2 = arith.constant 0 : i32
    return %c0_i32, %c0_i32_0, %c0_i32_1 : i32, i32, i32
  }
  func.func @transform_3(%arg0: i32) -> (i32, i32) {
    %c0_i32 = arith.constant 0 : i32
    %c0_i32_0 = arith.constant 0 : i32
    %c0_i32_1 = arith.constant 0 : i32
    return %c0_i32, %c0_i32_0 : i32, i32
  }
  func.func @transform_4(%arg0: i32) -> (i32, i32, i32) {
    %c0_i32 = arith.constant 0 : i32
    %c0_i32_0 = arith.constant 0 : i32
    %c0_i32_1 = arith.constant 0 : i32
    %c0_i32_2 = arith.constant 0 : i32
    return %c0_i32, %c0_i32_0, %c0_i32_1 : i32, i32, i32
  }
  func.func @transform_5(%arg0: i32) -> (i32, i32) {
    %c0_i32 = arith.constant 0 : i32
    %c0_i32_0 = arith.constant 0 : i32
    %c0_i32_1 = arith.constant 0 : i32
    return %c0_i32, %c0_i32_0 : i32, i32
  }
  func.func @transform_6(%arg0: i32) -> (i32, i32) {
    %c0_i32 = arith.constant 0 : i32
    %c0_i32_0 = arith.constant 0 : i32
    %c0_i32_1 = arith.constant 0 : i32
    return %c0_i32, %c0_i32_0 : i32, i32
  }
  func.func @transform_7(%arg0: i32) -> (i32, i32) {
    %c0_i32 = arith.constant 0 : i32
    %c0_i32_0 = arith.constant 0 : i32
    %c0_i32_1 = arith.constant 0 : i32
    return %c0_i32, %c0_i32_0 : i32, i32
  }
  func.func @transform_8(%arg0: i32) -> (i32, i32) {
    %c0_i32 = arith.constant 0 : i32
    %c0_i32_0 = arith.constant 0 : i32
    %c0_i32_1 = arith.constant 0 : i32
    return %c0_i32, %c0_i32_0 : i32, i32
  }
  func.func @transform_9(%arg0: i32) -> (i32, i32) {
    %c0_i32 = arith.constant 0 : i32
    %c0_i32_0 = arith.constant 0 : i32
    %c0_i32_1 = arith.constant 0 : i32
    return %c0_i32, %c0_i32_0 : i32, i32
  }
  func.func @transform_10(%arg0: i32) -> (i32, i32) {
    %c0_i32 = arith.constant 0 : i32
    %c0_i32_0 = arith.constant 0 : i32
    %c0_i32_1 = arith.constant 0 : i32
    return %c0_i32, %c0_i32_0 : i32, i32
  }
  func.func @transform_11(%arg0: i32) -> (i32, i32) {
    %c0_i32 = arith.constant 0 : i32
    %c0_i32_0 = arith.constant 0 : i32
    %c0_i32_1 = arith.constant 0 : i32
    return %c0_i32, %c0_i32_0 : i32, i32
  }
  func.func @transform_12(%arg0: i32) -> (i32, i32) {
    %c0_i32 = arith.constant 0 : i32
    %c0_i32_0 = arith.constant 0 : i32
    %c0_i32_1 = arith.constant 0 : i32
    return %c0_i32, %c0_i32_0 : i32, i32
  }
  func.func @transform_13(%arg0: i32) -> (i32, i32) {
    %c0_i32 = arith.constant 0 : i32
    %c0_i32_0 = arith.constant 0 : i32
    %c0_i32_1 = arith.constant 0 : i32
    return %c0_i32, %c0_i32_0 : i32, i32
  }
  func.func @transform_14(%arg0: i32) -> (i32, i32, i32) {
    %c0_i32 = arith.constant 0 : i32
    %c0_i32_0 = arith.constant 0 : i32
    %c0_i32_1 = arith.constant 0 : i32
    return %arg0, %c0_i32, %c0_i32_0 : i32, i32, i32
  }
}

</mosaic_0001>

<bundles_post_ra>
// kernel: tpu_custom_call.1
= control target key start
LH: loop header
LB: loop body
LE: loop exit
PB: predicated region body
PF: predicated region fallthrough
CT: control target
= control target key end

     0   :  { %s5187_s0 = inlined_call_operand.vmem [shape: f32[2,8,362], index: 0, kind: input, shape index: {}]   ;;  %s5188_s1 = inlined_call_operand.vmem [shape: f32[1,324], index: 1, kind: input, shape index: {}]   ;;  %s5189_s2 = inlined_call_operand.vmem [shape: f32[9,4,8], index: 2, kind: input, shape index: {}]   ;;  %s5190_s3 = inlined_call_operand.vmem [shape: f32[4,1], index: 3, kind: input, shape index: {}]   ;;  %s5191_s4 = inlined_call_operand.vmem [shape: f32[9,8,4], index: 4, kind: input, shape index: {}]   ;;  %s5192_s5 = inlined_call_operand.vmem [shape: f32[8,1], index: 5, kind: input, shape index: {}]   ;;  %s5193_s6 = inlined_call_operand.vmem [shape: f32[2,8], index: 6, kind: input, shape index: {}]   ;;  %s5194_s7 = inlined_call_operand.vmem [shape: f32[2,1], index: 7, kind: input, shape index: {}]   ;;  %s5195_s8 = inlined_call_operand.vmem [shape: f32[8,2], index: 8, kind: input, shape index: {}]   ;;  %s5196_s9 = inlined_call_operand.vmem [shape: f32[8,1], index: 9, kind: input, shape index: {}]   ;;  %s5197_s10 = inlined_call_operand.vmem [shape: f32[2,8], index: 10, kind: input, shape index: {}]   ;;  %s5198_s11 = inlined_call_operand.vmem [shape: f32[2,1], index: 11, kind: input, shape index: {}]   ;;  %s5199_s12 = inlined_call_operand.vmem [shape: f32[8,2], index: 12, kind: input, shape index: {}]   ;;  %s5200_s13 = inlined_call_operand.vmem [shape: f32[8,1], index: 13, kind: input, shape index: {}]   ;;  %s5201_s14 = inlined_call_operand.hbm [shape: f32[2,8,324], index: 14, kind: output, shape index: {}]  }
   0x1   :  { %5216 = sst [smem:[#allocation6_spill]] %s5187_s0 }
   0x2   :  { %5217 = sst [smem:[#allocation7_spill]] %s5188_s1 }
   0x3   :  { %5218 = sst [smem:[#allocation8_spill]] %s5189_s2 }
   0x4   :  { %19 = vsyncpa [#allocation4], 0 }
   0x5   :  { %21 = vsyncpa [#allocation4 + $0x1], 0  ;;  %s4648_s29 = smov 0   ;;  %s4650_s30 = smov 0  }
   0x6   :  { %s4652_s15 = smov 0   ;;  %s4654_s16 = smov 0  }
   0x7 LB: > { %s4669_s17 = sadd.s32 4294967295, %s4558_s16   ;;  %s4136_s18 = sadd.s32 4294967294, %s4558_s16   ;;  %s4558_s16 = sphi %s4654_s16, %s5234_s16   ;;  %s4554_s15 = sphi %s4652_s15, %s5233_s15   ;;  %s4550_s30 = sphi %s4650_s30, %s5232_s30   ;;  %s4546_s29 = sphi %s4648_s29, %s5231_s29  }
   0x8   : > { %s4673_s19 = sadd.s32 1, %s4558_s16   ;;  %s333_s20 = sadd.s32 1, %s4554_s15 }
   0x9   : > { %s330_s21 = ssub.s32 %s4558_s16, %s4673_s19  ;;  %p343_p0 = scmp.ne.s32.totalorder %s4554_s15, %s4550_s30 }
   0xa   : > { %p331_p1 = scmp.eq.s32.totalorder %s330_s21, 0  ;;  %p344_p2 = scmp.eq.s32.totalorder %s4669_s17, 1 }
   0xb   : > { %p349_p3 = scmp.ne.s32.totalorder %s4550_s30, %s4546_s29  ;;  %p350_p4 = scmp.eq.s32.totalorder %s4136_s18, 1 }
   0xc   : > { %s4684_s22 = scalar_select %p331_p1, %s4554_s15, %s333_s20  }
   0xd   : > { %p4686_p5 = por %p344_p2, %p343_p0  ;;  %p4690_p6 = por %p350_p4, %p349_p3 }
   0xe   : > { %p4139_p7 = scmp.ge.s32.totalorder %s4558_s16, 1  ;;  %p415_p8 = scmp.lt.s32.totalorder %s4558_s16, 3 }
  0x10   : > { %p416_p9 = pnand %p4139_p7, %p415_p8 }
  0x11   : > { %p461_p10 = scmp.lt.s32.totalorder (!%p416_p9), %s4669_s17, 1  ;;  %v4560_v0 = vmov (!%p416_p9), 0.0   ;;  %vm4561_vm0 = vmmov (!%p416_p9), 0   ;;  %s5221_s0 = sld [smem:[#allocation6_spill]] (!%p416_p9)  ;;  %v1904_v4 = vld [vmem:[%s5190_s3] sm:$0xf] (!%p416_p9) }
  0x12   : > { %419 = sbr.rel (%p416_p9) target bundleno = 2067 (0x813), region = 76  ;;  %4277 = vmatprep.subr.mxu1 (!%p416_p9), %v4560_v0  ;;  %1928 = vst [vmem:[#allocation2] sm:$0xff] (!%p416_p9), %v4560_v0  ;;  %556 = vmatprep.mubr.f32.mxu0 (!%p416_p9), %v4560_v0  ;;  %s4562_s20 = smov (!%p416_p9), 127   ;;  %v4570_v5 = vmov (!%p416_p9), 0   ;;  %vm482_vm1 = vcmask (!%p416_p9), 1039360   ;;  %vm488_vm2 = vcmask (!%p416_p9), 64512  }
  0x13   : > { %4279 = vmatprep.mubr.msk.f32.mxu1 (!%p416_p9), %vm4561_vm0, %v4560_v0  ;;  %s5212_s21 = smov (!%p416_p9), 126   ;;  %s5204_s27 = smov (!%p416_p9), 108   ;;  %4473 = vset.pattern.permute.xlu0 (!%p416_p9), %v4570_v5  ;;  %vm785_vm3 = vcmask (!%p416_p9), 1031168   ;;  %vm946_vm4 = vcmask (!%p416_p9), 900096   ;;  %vm1107_vm5 = vcmask (!%p416_p9), 891904   ;;  %vm1268_vm6 = vcmask (!%p416_p9), 883712  }
  0x14   : > { %s5206_s28 = smov (!%p416_p9), 92   ;;  %s5222_s2 = sld [smem:[#allocation8_spill]] (!%p416_p9)  ;;  %vm1429_vm7 = vcmask (!%p416_p9), 752640   ;;  %vm1590_vm8 = vcmask (!%p416_p9), 744448   ;;  %vm1751_vm9 = vcmask (!%p416_p9), 736256   ;;  %vm1929_vm10 = vcmask (!%p416_p9), 863232  }
  0x15   : > { %s5223_s1 = sld [smem:[#allocation7_spill]] (!%p416_p9)  ;;  %1930 = vst.msk [vmem:[#allocation2 + $0x8] sm:$0xf] (!%p416_p9), %vm1929_vm10, %v4560_v0  ;;  %vm1964_vm11 = vcmask (!%p416_p9), 1043608   ;;  %vm1965_vm12 = vcmask (!%p416_p9), 1047556   ;;  %vm1959_vm13 = vcmask (!%p416_p9), 154624  }
  0x16   : > { %vm1966_vm14 = vmor (!%p416_p9), %vm1965_vm12, %vm1964_vm11  ;;  %vm1968_vm15 = vcmask (!%p416_p9), 707584   ;;  %vm1990_vm10 = vcmask (!%p416_p9), 1043456   ;;  %vm1986_vm11 = vcmask (!%p416_p9), 31744  }
  0x19   : > { %s462_s25 = scalar_select %p461_p10, %s4669_s17, 1 }
  0x1a   : > { %v4141_v11 = vld [vmem:[%s5222_s2 + $0x4] sm:$0xf]  ;;  %v467_v16 = vld [vmem:[%s5222_s2] sm:$0xf]  ;;  %v4146_v19 = vld [vmem:[%s5222_s2 + $0x8] sm:$0xf] }
  0x1b   : > { %s4420_s26 = smul.u32 24, %s462_s25  ;;  %s5208_s25 = smov 110   ;;  %v4149_v24 = vld [vmem:[%s5222_s2 + $0xc] sm:$0xf]  ;;  %v4152_v27 = vld [vmem:[%s5222_s2 + $0x10] sm:$0xf] }
  0x1c   : > { %v4155_v32 = vld [vmem:[%s5222_s2 + $0x14] sm:$0xf]  ;;  %v4158_v36 = vld [vmem:[%s5222_s2 + $0x18] sm:$0xf]  ;;  %v4161_v40 = vld [vmem:[%s5222_s2 + $0x1c] sm:$0xf] }
  0x1d   : > { %s4706_s18 = scalar_lea.vmem %s5221_s0, %s4420_s26  ;;  %s5202_s26 = smov 109   ;;  %v4164_v46 = vld [vmem:[%s5222_s2 + $0x20] sm:$0xf] }
  0x1e   : > { %v4709_v1 = vld [vmem:[%s4706_s18 + $0x8] sm:$0xff]  ;;  %v4712_v2 = vld [vmem:[%s4706_s18] sm:$0xff]  ;;  %v4719_v3 = vld [vmem:[%s4706_s18 + $0x10] sm:$0xff] }
  0x1f   : > { %478 = vrot.lane.b32.xlu0 %v4709_v1, %s4562_s20  ;;  %476 = vrot.lane.b32.xlu1 %v4712_v2, %s4562_s20 }
  0x23   : > { %480 = vrot.lane.b32.xlu0 %v4719_v3, %s4562_s20  ;;  %781 = vrot.lane.b32.xlu1 %v4709_v1, %s5212_s21 }
  0x27   : > { %783 = vrot.lane.b32.xlu0 %v4719_v3, %s5212_s21  ;;  %779 = vrot.lane.b32.xlu1 %v4712_v2, %s5212_s21  ;;  %s5225_s21 = smov 110  }
  0x2b   : > { %942 = vrot.lane.b32.xlu0 %v4709_v1, %s5208_s25  ;;  %944 = vrot.lane.b32.xlu1 %v4719_v3, %s5208_s25 }
  0x2f   : > { %940 = vrot.lane.b32.xlu0 %v4712_v2, %s5208_s25  ;;  %1103 = vrot.lane.b32.xlu1 %v4709_v1, %s5202_s26  ;;  %s5226_s25 = smov 109  }
  0x33   : > { %1105 = vrot.lane.b32.xlu0 %v4719_v3, %s5202_s26  ;;  %1101 = vrot.lane.b32.xlu1 %v4712_v2, %s5202_s26  ;;  %s5210_s26 = smov 91  }
  0x37   : > { %1264 = vrot.lane.b32.xlu0 %v4709_v1, %s5204_s27  ;;  %1266 = vrot.lane.b32.xlu1 %v4719_v3, %s5204_s27 }
  0x3b   : > { %1262 = vrot.lane.b32.xlu0 %v4712_v2, %s5204_s27  ;;  %1425 = vrot.lane.b32.xlu1 %v4709_v1, %s5206_s28  ;;  %s4569_s27 = smov 90  }
  0x3f   : > { %1427 = vrot.lane.b32.xlu0 %v4719_v3, %s5206_s28  ;;  %1423 = vrot.lane.b32.xlu1 %v4712_v2, %s5206_s28  ;;  %s5224_s28 = smov 126  }
  0x43   : > { %1586 = vrot.lane.b32.xlu0 %v4709_v1, %s5210_s26  ;;  %1588 = vrot.lane.b32.xlu1 %v4719_v3, %s5210_s26 }
  0x47   : > { %1584 = vrot.lane.b32.xlu0 %v4712_v2, %s5210_s26  ;;  %1747 = vrot.lane.b32.xlu1 %v4709_v1, %s4569_s27  ;;  %s5214_s26 = smov 19  }
  0x4b   : > { %1749 = vrot.lane.b32.xlu0 %v4719_v3, %s4569_s27  ;;  %1745 = vrot.lane.b32.xlu1 %v4712_v2, %s4569_s27 }
  0x4f   : > { %1907 = vperm.xlu0 %4473, %v1904_v4  }
  0x91   : > { %v479_v6 = vpop.permute.xlu0 %478  ;;  %v477_v7 = vpop.permute.xlu1 %476 }
  0x92   : > { %v483_v12 = vsel %vm482_vm1, %v477_v7, %v479_v6 }
  0x95   : > { %v481_v8 = vpop.permute.xlu0 %480  ;;  %v782_v9 = vpop.permute.xlu1 %781 }
  0x96   : > { %4278 = vmatpush3.msra.mxu1 %v481_v8  ;;  %v484_v10 = vsel %vm482_vm1, %v479_v6, %v481_v8 }
  0x97   : > { %492 = vmatprep.subr.mxu0 %v484_v10  ;;  %4280 = vmatmul.mubr.msk.f32.vlgmr.msra.gmra.mrb[0].mxu1 %vm488_vm2, %v4141_v11 }
  0x98   : > { %493 = vmatpush1.msra.mxu0 %v483_v12  ;;  %4282 = vmatprep.subr.mxu1 %v4560_v0 }
  0x99   : > { %v784_v13 = vpop.permute.xlu0 %783  ;;  %4142 = vmatmul.mubr.msk.f32.vlgmr.msra.gmra.mrb[0].mxu0 %vm488_vm2, %v4141_v11  ;;  %636 = vmatprep.subr.mxu0 %v4709_v1  ;;  %v780_v14 = vpop.permute.xlu1 %779 }
  0x9a   : > { %637 = vmatpush1.msra.mxu0 %v4712_v2  ;;  %700 = vmatprep.mubr.f32.mxu0 %v4560_v0  ;;  %v787_v15 = vsel %vm785_vm3, %v782_v9, %v784_v13  ;;  %v786_v20 = vsel %vm785_vm3, %v780_v14, %v782_v9 }
  0x9b   : > { %4283 = vmatpush3.msra.mxu1 %v4719_v3  ;;  %794 = vmatprep.subr.mxu0 %v787_v15 }
  0x9c   : > { %4284 = vmatprep.mubr.msk.f32.mxu1 %vm4561_vm0, %v4560_v0  ;;  %4287 = vmatprep.subr.mxu1 %v4560_v0 }
  0x9d   : > { %v943_v17 = vpop.permute.xlu0 %942  ;;  %v945_v18 = vpop.permute.xlu1 %944  ;;  %4285 = vmatmul.mubr.msk.f32.vlgmr.msra.gmra.mrb[2].mxu1 %vm488_vm2, %v467_v16 }
  0x9e   : > { %4288 = vmatpush3.msra.mxu1 %v784_v13  ;;  %4289 = vmatprep.mubr.msk.f32.mxu1 %vm4561_vm0, %v4560_v0  ;;  %v948_v21 = vsel %vm946_vm4, %v943_v17, %v945_v18 }
  0x9f   : > { %4292 = vmatprep.subr.mxu1 %v4560_v0 }
  0xa1   : > { %v941_v22 = vpop.permute.xlu0 %940  ;;  %4144 = vmatmul.mubr.msk.f32.vlgmr.msra.gmra.mrb[0].mxu0 %vm488_vm2, %v467_v16  ;;  %v1104_v23 = vpop.permute.xlu1 %1103  ;;  %4290 = vmatmul.mubr.msk.f32.vlgmr.msra.gmra.mrb[4].mxu1 %vm488_vm2, %v4146_v19 }
  0xa2   : > { %795 = vmatpush1.msra.mxu0 %v786_v20  ;;  %858 = vmatprep.mubr.f32.mxu0 %v4560_v0  ;;  %v947_v28 = vsel %vm946_vm4, %v941_v22, %v943_v17 }
  0xa3   : > { %955 = vmatprep.subr.mxu0 %v948_v21  ;;  %4293 = vmatpush3.msra.mxu1 %v945_v18 }
  0xa4   : > { %4294 = vmatprep.mubr.msk.f32.mxu1 %vm4561_vm0, %v4560_v0  ;;  %4297 = vmatprep.subr.mxu1 %v4560_v0 }
  0xa5   : > { %v1106_v25 = vpop.permute.xlu0 %1105  ;;  %v1102_v26 = vpop.permute.xlu1 %1101  ;;  %4295 = vmatmul.mubr.msk.f32.vlgmr.msra.gmra.mrb[6].mxu1 %vm488_vm2, %v4149_v24 }
  0xa6   : > { %4298 = vmatpush3.msra.mxu1 %v1106_v25  ;;  %4299 = vmatprep.mubr.msk.f32.mxu1 %vm4561_vm0, %v4560_v0  ;;  %v1109_v29 = vsel %vm1107_vm5, %v1104_v23, %v1106_v25  ;;  %v1108_v35 = vsel %vm1107_vm5, %v1102_v26, %v1104_v23 }
  0xa7   : > { %4302 = vmatprep.subr.mxu1 %v4560_v0 }
  0xa9   : > { %v1265_v30 = vpop.permute.xlu0 %1264  ;;  %4147 = vmatmul.mubr.msk.f32.vlgmr.msra.gmra.mrb[0].mxu0 %vm488_vm2, %v4146_v19  ;;  %v1267_v31 = vpop.permute.xlu1 %1266  ;;  %4300 = vmatmul.mubr.msk.f32.vlgmr.msra.gmra.mrb[8].mxu1 %vm488_vm2, %v4152_v27 }
  0xaa   : > { %956 = vmatpush1.msra.mxu0 %v947_v28  ;;  %1019 = vmatprep.mubr.f32.mxu0 %v4560_v0  ;;  %v1270_v39 = vsel %vm1268_vm6, %v1265_v30, %v1267_v31 }
  0xab   : > { %1116 = vmatprep.subr.mxu0 %v1109_v29  ;;  %4303 = vmatpush3.msra.mxu1 %v1267_v31 }
  0xac   : > { %4304 = vmatprep.mubr.msk.f32.mxu1 %vm4561_vm0, %v4560_v0  ;;  %4307 = vmatprep.subr.mxu1 %v4560_v0 }
  0xad   : > { %v1263_v33 = vpop.permute.xlu0 %1262  ;;  %v1426_v34 = vpop.permute.xlu1 %1425  ;;  %4305 = vmatmul.mubr.msk.f32.vlgmr.msra.gmra.mrb[10].mxu1 %vm488_vm2, %v4155_v32 }
  0xae   : > { %4309 = vmatprep.mubr.msk.f32.mxu1 %vm4561_vm0, %v4560_v0  ;;  %v1269_v43 = vsel %vm1268_vm6, %v1263_v33, %v1265_v30  ;;  %v1932_v30 = vlaneseq }
  0xb0   : > { %v1933_v31 = vshrl.u32 %v1932_v30, 7  ;;  %v4190_v30 = vld [vmem:[%s5191_s4 + $0x20] sm:$0xff] }
  0xb1   : > { %v1428_v37 = vpop.permute.xlu0 %1427  ;;  %4150 = vmatmul.mubr.msk.f32.vlgmr.msra.gmra.mrb[0].mxu0 %vm488_vm2, %v4149_v24  ;;  %v1424_v38 = vpop.permute.xlu1 %1423 }
  0xb2   : > { %1117 = vmatpush1.msra.mxu0 %v1108_v35  ;;  %4308 = vmatpush3.msra.mxu1 %v1428_v37  ;;  %v1431_v44 = vsel %vm1429_vm7, %v1426_v34, %v1428_v37  ;;  %v1430_v48 = vsel %vm1429_vm7, %v1424_v38, %v1426_v34  ;;  %v1934_v33 = vsub.s32 0, %v1933_v31  ;;  %v1938_v35 = vsub.s32 1, %v1933_v31 }
  0xb3   : > { %4310 = vmatmul.mubr.msk.f32.vlgmr.msra.gmra.mrb[12].mxu1 %vm488_vm2, %v4158_v36  ;;  %1180 = vmatprep.mubr.f32.mxu0 %v4560_v0 }
  0xb4   : > { %1277 = vmatprep.subr.mxu0 %v1270_v39  ;;  %4312 = vmatprep.subr.mxu1 %v4560_v0  ;;  %v466_v39 = vld [vmem:[%s5223_s1] sm:$0x7]  ;;  %s4572_s1 = smov [#allocation3]  }
  0xb5   : > { %v1587_v41 = vpop.permute.xlu0 %1586  ;;  %v1589_v42 = vpop.permute.xlu1 %1588  ;;  %4314 = vmatprep.mubr.msk.f32.mxu1 %vm4561_vm0, %v4560_v0  ;;  %s4500_s2 = sshll.u32 %s4572_s1, 4  ;;  %s4501_s2 = int_to_ptr.vmem [resolvable:$false] %s4500_s2 }
  0xb6   : > { %4313 = vmatpush3.msra.mxu1 %v1589_v42  ;;  %v1592_v49 = vsel %vm1590_vm8, %v1587_v41, %v1589_v42  ;;  %v4871_v42 = vrot.slane %v466_v39, %v1934_v33 }
  0xb7   : > { %4315 = vmatmul.mubr.msk.f32.vlgmr.msra.gmra.mrb[14].mxu1 %vm488_vm2, %v4161_v40  ;;  %4317 = vmatprep.subr.mxu1 %v4560_v0 }
  0xb8   : > { %4319 = vmatprep.mubr.msk.f32.mxu1 %vm4561_vm0, %v4560_v0 }
  0xb9   : > { %v1585_v45 = vpop.permute.xlu0 %1584  ;;  %4153 = vmatmul.mubr.msk.f32.vlgmr.msra.gmra.mrb[0].mxu0 %vm488_vm2, %v4152_v27  ;;  %v1748_v50 = vpop.permute.xlu1 %1747 }
  0xba   : > { %1278 = vmatpush1.msra.mxu0 %v1269_v43  ;;  %1341 = vmatprep.mubr.f32.mxu0 %v4560_v0  ;;  %v1591_v51 = vsel %vm1590_vm8, %v1585_v45, %v1587_v41 }
  0xbb   : > { %1438 = vmatprep.subr.mxu0 %v1431_v44  ;;  %v4874_v44 = vrot.slane %v466_v39, %v1938_v35 }
  0xbd   : > { %v1750_v47 = vpop.permute.xlu0 %1749  ;;  %v1746_v53 = vpop.permute.xlu1 %1745 }
  0xbe   : > { %4318 = vmatpush3.msra.mxu1 %v1750_v47  ;;  %v1753_v52 = vsel %vm1751_vm9, %v1748_v50, %v1750_v47  ;;  %v1752_v54 = vsel %vm1751_vm9, %v1746_v53, %v1748_v50 }
  0xbf   : > { %4320 = vmatmul.mubr.msk.f32.vlgmr.msra.gmra.mrb[16].mxu1 %vm488_vm2, %v4164_v46  ;;  %4322 = vmatprep.subr.mxu1 %v4560_v0 }
  0xc0   : > { %4324 = vmatprep.mubr.msk.f32.mxu1 %vm4561_vm0, %v4560_v0 }
  0xc1   : > { %4156 = vmatmul.mubr.msk.f32.vlgmr.msra.gmra.mrb[0].mxu0 %vm488_vm2, %v4155_v32 }
  0xc2   : > { %1439 = vmatpush1.msra.mxu0 %v1430_v48  ;;  %1502 = vmatprep.mubr.f32.mxu0 %v4560_v0  ;;  %v1942_v48 = vsub.s32 2, %v1933_v31 }
  0xc3   : > { %1599 = vmatprep.subr.mxu0 %v1592_v49 }
  0xc4   : > { %v4878_v53 = vrot.slane %v466_v39, %v1942_v48 }
  0xc9   : > { %4159 = vmatmul.mubr.msk.f32.vlgmr.msra.gmra.mrb[0].mxu0 %vm488_vm2, %v4158_v36 }
  0xca   : > { %1600 = vmatpush1.msra.mxu0 %v1591_v51  ;;  %1663 = vmatprep.mubr.f32.mxu0 %v4560_v0 }
  0xcb   : > { %1760 = vmatprep.subr.mxu0 %v1753_v52 }
  0xce   : > { %v1908_v21 = vpop.permute.xlu0 %1907 }
  0xd1   : > { %4162 = vmatmul.mubr.msk.f32.vlgmr.msra.gmra.mrb[0].mxu0 %vm488_vm2, %v4161_v40 }
  0xd2   : > { %1761 = vmatpush1.msra.mxu0 %v1752_v54  ;;  %1824 = vmatprep.mubr.f32.mxu0 %v4560_v0 }
  0xd9   : > { %4165 = vmatmul.mubr.msk.f32.vlgmr.msra.gmra.mrb[0].mxu0 %vm488_vm2, %v4164_v46 }
  0xda   : > { %2061 = vmatprep.mubr.f32.mxu0 %v4560_v0 }
 0x16a   : > { %v629_v55 = vpop.f32.mrb[0].mxu1 }
 0x16b   : > { %v4281_v56 = vpop.f32.mrb[1].mxu1 }
 0x170   : > { %v773_v57 = vpop.f32.mrb[2].mxu1 }
 0x171   : > { %v774_v58 = vadd.f32 %v773_v57, %v629_v55  ;;  %v4286_v59 = vpop.f32.mrb[3].mxu1 }
 0x174   : > { %v931_v60 = vpop.f32.mrb[4].mxu1 }
 0x175   : > { %v937_v61 = vadd.f32 %v931_v60, %v774_v58  ;;  %v4291_v62 = vpop.f32.mrb[5].mxu1 }
 0x178   : > { %v1092_v63 = vpop.f32.mrb[6].mxu1 }
 0x179   : > { %v1098_v4 = vadd.f32 %v1092_v63, %v937_v61  ;;  %v4296_v5 = vpop.f32.mrb[7].mxu1 }
 0x17c   : > { %v1253_v6 = vpop.f32.mrb[8].mxu1 }
 0x17d   : > { %v1259_v7 = vadd.f32 %v1253_v6, %v1098_v4  ;;  %v4301_v8 = vpop.f32.mrb[9].mxu1 }
 0x180   : > { %v1414_v9 = vpop.f32.mrb[10].mxu1 }
 0x181   : > { %v1420_v10 = vadd.f32 %v1414_v9, %v1259_v7  ;;  %v4306_v11 = vpop.f32.mrb[11].mxu1 }
 0x186   : > { %v1575_v12 = vpop.f32.mrb[12].mxu1 }
 0x187   : > { %v1581_v13 = vadd.f32 %v1575_v12, %v1420_v10  ;;  %v4311_v14 = vpop.f32.mrb[13].mxu1  ;;  %v3464_v10 = vld [vmem:[%s5192_s5] sm:$0xff] }
 0x18a   : > { %v1736_v15 = vpop.f32.mrb[14].mxu1 }
 0x18b   : > { %v1742_v16 = vadd.f32 %v1736_v15, %v1581_v13  ;;  %v4316_v17 = vpop.f32.mrb[15].mxu1  ;;  %v4167_v13 = vld [vmem:[%s5191_s4 + $0x8] sm:$0xff] }
 0x192   : > { %v1897_v18 = vpop.f32.mrb[16].mxu1 }
 0x193   : > { %v1903_v19 = vadd.f32 %v1897_v18, %v1742_v16  ;;  %v4321_v20 = vpop.f32.mrb[17].mxu1  ;;  %v1970_v18 = vld [vmem:[%s5191_s4] sm:$0xff] }
 0x195   : > { %v1912_v22 = vadd.f32 %v1908_v21, %v1903_v19 }
 0x197   : > { %v1915_v23 = vmul.f32 0.5, %v1912_v22 }
 0x199   : > { %4475 = vtanh.f32 %v1915_v23 }
 0x1a3   : > { %v4476_v32 = vpop.eup %4475 }
 0x1a4   : > { %v1921_v38 = vadd.f32 1.0, %v4476_v32 }
 0x1a6   : > { %v1924_v46 = vmul.f32 0.5, %v1921_v38 }
 0x1a8   : > { %v1927_v51 = vmul.f32 %v1924_v46, %v1912_v22  ;;  %v4178_v22 = vld [vmem:[%s5191_s4 + $0x10] sm:$0xff]  ;;  %v4208_v46 = vld [vmem:[%s5191_s4 + $0x38] sm:$0xff] }
 0x1aa   : > { %v1949_v54 = vmul.f32 %v4878_v53, %v1927_v51 }
 0x1ac   : > { %v1826_v24 = vpop.f32.mrb[0].mxu0 }
 0x1ad   : > { %v1910_v25 = vadd.f32 %v1908_v21, %v1826_v24  ;;  %v1828_v26 = vpop.f32.mrb[1].mxu0 }
 0x1ae   : > { %v1911_v27 = vadd.f32 %v1908_v21, %v1828_v26 }
 0x1af   : > { %v1913_v28 = vmul.f32 0.5, %v1910_v25 }
 0x1b0   : > { %v1914_v29 = vmul.f32 0.5, %v1911_v27 }
 0x1b1   : > { %4477 = vtanh.f32 %v1913_v28 }
 0x1b2   : > { %4479 = vtanh.f32 %v1914_v29 }
 0x1bb   : > { %v4478_v34 = vpop.eup %4477 }
 0x1bc   : > { %v4480_v36 = vpop.eup %4479  ;;  %v1919_v37 = vadd.f32 1.0, %v4478_v34  ;;  %v4196_v34 = vld [vmem:[%s5191_s4 + $0x28] sm:$0xff] }
 0x1bd   : > { %v1920_v40 = vadd.f32 1.0, %v4480_v36 }
 0x1be   : > { %v1922_v41 = vmul.f32 0.5, %v1919_v37 }
 0x1bf   : > { %v1923_v43 = vmul.f32 0.5, %v1920_v40 }
 0x1c0   : > { %v1925_v45 = vmul.f32 %v1922_v41, %v1910_v25  ;;  %v4184_v25 = vld [vmem:[%s5191_s4 + $0x18] sm:$0xff]  ;;  %v4202_v41 = vld [vmem:[%s5191_s4 + $0x30] sm:$0xff] }
 0x1c1   : > { %v1926_v47 = vmul.f32 %v1923_v43, %v1911_v27 }
 0x1c2   : > { %v1947_v49 = vmul.f32 %v4871_v42, %v1925_v45 }
 0x1c3   : > { %v1948_v50 = vmul.f32 %v4874_v44, %v1926_v47 }
 0x1c5   : > { %v1953_v52 = vcombine.low %v1947_v49, %v1948_v50 }
 0x1c7   : > { %1954 = vrot.lane.b32.xlu1 %v1953_v52, %s5214_s26  ;;  %v4214_v52 = vld [vmem:[%s5191_s4 + $0x40] sm:$0xff] }
 0x1cb   : > { %1956 = vrot.lane.b32.xlu1 %v1949_v54, %s5214_s26 }
 0x239   : > { %v1955_v55 = vpop.permute.xlu1 %1954 }
 0x23a   : > { %v1958_v56 = vrot.slane %v1955_v55, 4 }
 0x23c   : > { %v1960_v57 = vsel %vm1959_vm13, %v1958_v56, %v1955_v55 }
 0x23d   : > { %1967 = vst.msk [vmem:[#allocation2] sm:$0xff] %vm1966_vm14, %v1960_v57  ;;  %v1957_v58 = vpop.permute.xlu1 %1956 }
 0x23e   : > { %v1961_v59 = vsel %vm1959_vm13, %v1958_v56, %v1957_v58 }
 0x23f   : > { %1969 = vst.msk [vmem:[#allocation2 + $0x8] sm:$0xf] %vm1968_vm15, %v1961_v59 }
 0x244   : > { %v1971_v60 = vld [vmem:[#allocation2] sm:$0xff] }
 0x245   : > { %v1977_v61 = vcombine.high %v1971_v60, %v1971_v60 }
 0x246   : > { %v1972_v62 = vld [vmem:[#allocation2 + $0x8] sm:$0xf] }
 0x247   : > { %1980 = vrot.lane.b32.xlu0 %v1977_v61, %s4562_s20  ;;  %1982 = vrot.lane.b32.xlu1 %v1972_v62, %s4562_s20  ;;  %v2291_v63 = vld [vmem:[#allocation2 + $0x8] sm:$0xf] }
 0x248   : > { %v2459_v4 = vld [vmem:[#allocation2 + $0x8] sm:$0xf] }
 0x249   : > { %v2627_v5 = vld [vmem:[#allocation2 + $0x8] sm:$0xf] }
 0x24a   : > { %v2795_v6 = vld [vmem:[#allocation2 + $0x8] sm:$0xf] }
 0x24b   : > { %1978 = vrot.lane.b32.xlu0 %v1971_v60, %s4562_s20  ;;  %2297 = vrot.lane.b32.xlu1 %v1977_v61, %s5224_s28  ;;  %s5227_s20 = smov 108   ;;  %v2963_v7 = vld [vmem:[#allocation2 + $0x8] sm:$0xf] }
 0x24c   : > { %v3131_v8 = vld [vmem:[#allocation2 + $0x8] sm:$0xf] }
 0x24d   : > { %v3299_v9 = vld [vmem:[#allocation2 + $0x8] sm:$0xf] }
 0x24f   : > { %2299 = vrot.lane.b32.xlu0 %v2291_v63, %s5224_s28  ;;  %2295 = vrot.lane.b32.xlu1 %v1971_v60, %s5224_s28  ;;  %s5228_s28 = smov 92  }
 0x253   : > { %2465 = vrot.lane.b32.xlu0 %v1977_v61, %s5225_s21  ;;  %2467 = vrot.lane.b32.xlu1 %v2459_v4, %s5225_s21 }
 0x257   : > { %2463 = vrot.lane.b32.xlu0 %v1971_v60, %s5225_s21  ;;  %2633 = vrot.lane.b32.xlu1 %v1977_v61, %s5226_s25  ;;  %s5229_s21 = smov 91  }
 0x25b   : > { %2635 = vrot.lane.b32.xlu0 %v2627_v5, %s5226_s25  ;;  %2631 = vrot.lane.b32.xlu1 %v1971_v60, %s5226_s25 }
 0x25f   : > { %2801 = vrot.lane.b32.xlu0 %v1977_v61, %s5227_s20  ;;  %2803 = vrot.lane.b32.xlu1 %v2795_v6, %s5227_s20 }
 0x263   : > { %2799 = vrot.lane.b32.xlu0 %v1971_v60, %s5227_s20  ;;  %2969 = vrot.lane.b32.xlu1 %v1977_v61, %s5228_s28 }
 0x267   : > { %2971 = vrot.lane.b32.xlu0 %v2963_v7, %s5228_s28  ;;  %2967 = vrot.lane.b32.xlu1 %v1971_v60, %s5228_s28  ;;  %s5230_s28 = smov 19  }
 0x26b   : > { %3137 = vrot.lane.b32.xlu0 %v1977_v61, %s5229_s21  ;;  %3139 = vrot.lane.b32.xlu1 %v3131_v8, %s5229_s21 }
 0x26f   : > { %3135 = vrot.lane.b32.xlu0 %v1971_v60, %s5229_s21  ;;  %3305 = vrot.lane.b32.xlu1 %v1977_v61, %s4569_s27  ;;  %s4421_s21 = smul.u32 384, %s4669_s17 }
 0x271   : > { %s5142_s20 = scalar_lea.hbm %s5201_s14, %s4421_s21  ;;  %s4502_s21 = scalar_lea.vmem %s4501_s2, 768 }
 0x273   : > { %3307 = vrot.lane.b32.xlu0 %v3299_v9, %s4569_s27  ;;  %3303 = vrot.lane.b32.xlu1 %v1971_v60, %s4569_s27 }
 0x277   : > { %3467 = vperm.xlu0 %4473, %v3464_v10  }
 0x27b   : > { %3508 = vrot.lane.b32.xlu0 %v4871_v42, %s5230_s28 }
 0x2b9   : > { %v1981_v11 = vpop.permute.xlu0 %1980  ;;  %v1983_v12 = vpop.permute.xlu1 %1982 }
 0x2ba   : > { %v1985_v14 = vsel %vm482_vm1, %v1981_v11, %v1983_v12  ;;  %4323 = vmatpush3.msk.msra.mxu1 %vm1990_vm10, %v1983_v12 }
 0x2bb   : > { %4168 = vmatprep.subr.msk.mxu0 %vm1990_vm10, %v1985_v14  ;;  %4327 = vmatprep.subr.mxu1 %v4560_v0 }
 0x2bc   : > { %4325 = vmatmul.mubr.msk.f32.vlgmr.msra.gmra.mrb[18].mxu1 %vm1986_vm11, %v4167_v13 }
 0x2bd   : > { %4328 = vmatpush3.msk.msra.mxu1 %vm1990_vm10, %v1972_v62  ;;  %v1979_v15 = vpop.permute.xlu0 %1978  ;;  %v2298_v16 = vpop.permute.xlu1 %2297  ;;  %4329 = vmatprep.mubr.msk.f32.mxu1 %vm4561_vm0, %v4560_v0 }
 0x2be   : > { %v1984_v17 = vsel %vm482_vm1, %v1979_v15, %v1981_v11  ;;  %4332 = vmatprep.subr.mxu1 %v4560_v0  ;;  %vm3853_vm1 = vcmask 556032  }
 0x2bf   : > { %4169 = vmatpush1.msk.msra.mxu0 %vm1990_vm10, %v1984_v17 }
 0x2c0   : > { %4170 = vmatmul.mubr.msk.f32.vlgmr.msra.gmra.mrb[2].mxu0 %vm1986_vm11, %v4167_v13  ;;  %4173 = vmatprep.subr.msk.mxu0 %vm1990_vm10, %v1977_v61 }
 0x2c1   : > { %v2300_v19 = vpop.permute.xlu0 %2299  ;;  %4174 = vmatpush1.msk.msra.mxu0 %vm1990_vm10, %v1971_v60  ;;  %v2296_v20 = vpop.permute.xlu1 %2295  ;;  %4330 = vmatmul.mubr.msk.f32.vlgmr.msra.gmra.mrb[20].mxu1 %vm1986_vm11, %v1970_v18 }
 0x2c2   : > { %v2302_v21 = vsel %vm785_vm3, %v2298_v16, %v2300_v19  ;;  %4333 = vmatpush3.msk.msra.mxu1 %vm1990_vm10, %v2300_v19  ;;  %4334 = vmatprep.mubr.msk.f32.mxu1 %vm4561_vm0, %v4560_v0  ;;  %v2301_v26 = vsel %vm785_vm3, %v2296_v20, %v2298_v16  ;;  %vm3701_vm3 = vcmask 1041408  }
 0x2c3   : > { %4179 = vmatprep.subr.msk.mxu0 %vm1990_vm10, %v2302_v21  ;;  %4337 = vmatprep.subr.mxu1 %v4560_v0 }
 0x2c4   : > { %2211 = vmatprep.mubr.f32.mxu0 %v4560_v0 }
 0x2c5   : > { %v2466_v23 = vpop.permute.xlu0 %2465  ;;  %v2468_v24 = vpop.permute.xlu1 %2467  ;;  %4335 = vmatmul.mubr.msk.f32.vlgmr.msra.gmra.mrb[22].mxu1 %vm1986_vm11, %v4178_v22 }
 0x2c6   : > { %4338 = vmatpush3.msk.msra.mxu1 %vm1990_vm10, %v2468_v24  ;;  %4339 = vmatprep.mubr.msk.f32.mxu1 %vm4561_vm0, %v4560_v0  ;;  %v2470_v27 = vsel %vm946_vm4, %v2466_v23, %v2468_v24 }
 0x2c7   : > { %4342 = vmatprep.subr.mxu1 %v4560_v0 }
 0x2c8   : > { %4175 = vmatmul.mubr.msk.f32.vlgmr.msra.gmra.mrb[2].mxu0 %vm1986_vm11, %v1970_v18 }
 0x2c9   : > { %4180 = vmatpush1.msk.msra.mxu0 %vm1990_vm10, %v2301_v26  ;;  %v2464_v28 = vpop.permute.xlu0 %2463  ;;  %v2634_v29 = vpop.permute.xlu1 %2633  ;;  %4340 = vmatmul.mubr.msk.f32.vlgmr.msra.gmra.mrb[24].mxu1 %vm1986_vm11, %v4184_v25 }
 0x2ca   : > { %4185 = vmatprep.subr.msk.mxu0 %vm1990_vm10, %v2470_v27  ;;  %2376 = vmatprep.mubr.f32.mxu0 %v4560_v0  ;;  %v2469_v33 = vsel %vm946_vm4, %v2464_v28, %v2466_v23  ;;  %vm3697_vm4 = vcmask 15360  }
 0x2cb   : > { %4344 = vmatprep.mubr.msk.f32.mxu1 %vm4561_vm0, %v4560_v0 }
 0x2cd   : > { %v2636_v31 = vpop.permute.xlu0 %2635  ;;  %v2632_v32 = vpop.permute.xlu1 %2631 }
 0x2ce   : > { %4343 = vmatpush3.msk.msra.mxu1 %vm1990_vm10, %v2636_v31  ;;  %v2638_v35 = vsel %vm1107_vm5, %v2634_v29, %v2636_v31  ;;  %v2637_v40 = vsel %vm1107_vm5, %v2632_v32, %v2634_v29 }
 0x2cf   : > { %4347 = vmatprep.subr.mxu1 %v4560_v0  ;;  %4345 = vmatmul.mubr.msk.f32.vlgmr.msra.gmra.mrb[26].mxu1 %vm1986_vm11, %v4190_v30 }
 0x2d0   : > { %4181 = vmatmul.mubr.msk.f32.vlgmr.msra.gmra.mrb[2].mxu0 %vm1986_vm11, %v4178_v22  ;;  %4349 = vmatprep.mubr.msk.f32.mxu1 %vm4561_vm0, %v4560_v0 }
 0x2d1   : > { %4186 = vmatpush1.msk.msra.mxu0 %vm1990_vm10, %v2469_v33  ;;  %v2802_v36 = vpop.permute.xlu0 %2801  ;;  %v2804_v37 = vpop.permute.xlu1 %2803  ;;  %2544 = vmatprep.mubr.f32.mxu0 %v4560_v0 }
 0x2d2   : > { %4191 = vmatprep.subr.msk.mxu0 %vm1990_vm10, %v2638_v35  ;;  %4348 = vmatpush3.msk.msra.mxu1 %vm1990_vm10, %v2804_v37  ;;  %v2806_v42 = vsel %vm1268_vm6, %v2802_v36, %v2804_v37 }
 0x2d3   : > { %4352 = vmatprep.subr.mxu1 %v4560_v0  ;;  %4350 = vmatmul.mubr.msk.f32.vlgmr.msra.gmra.mrb[28].mxu1 %vm1986_vm11, %v4196_v34 }
 0x2d4   : > { %4354 = vmatprep.mubr.msk.f32.mxu1 %vm4561_vm0, %v4560_v0 }
 0x2d5   : > { %v2800_v38 = vpop.permute.xlu0 %2799  ;;  %v2970_v39 = vpop.permute.xlu1 %2969 }
 0x2d6   : > { %v2805_v49 = vsel %vm1268_vm6, %v2800_v38, %v2802_v36 }
 0x2d8   : > { %4187 = vmatmul.mubr.msk.f32.vlgmr.msra.gmra.mrb[2].mxu0 %vm1986_vm11, %v4184_v25 }
 0x2d9   : > { %4192 = vmatpush1.msk.msra.mxu0 %vm1990_vm10, %v2637_v40  ;;  %v2972_v43 = vpop.permute.xlu0 %2971  ;;  %v2968_v45 = vpop.permute.xlu1 %2967  ;;  %2712 = vmatprep.mubr.f32.mxu0 %v4560_v0 }
 0x2da   : > { %4197 = vmatprep.subr.msk.mxu0 %vm1990_vm10, %v2806_v42  ;;  %4353 = vmatpush3.msk.msra.mxu1 %vm1990_vm10, %v2972_v43  ;;  %v2974_v50 = vsel %vm1429_vm7, %v2970_v39, %v2972_v43  ;;  %v2973_v55 = vsel %vm1429_vm7, %v2968_v45, %v2970_v39 }
 0x2db   : > { %4357 = vmatprep.subr.mxu1 %v4560_v0  ;;  %4355 = vmatmul.mubr.msk.f32.vlgmr.msra.gmra.mrb[30].mxu1 %vm1986_vm11, %v4202_v41 }
 0x2dc   : > { %4359 = vmatprep.mubr.msk.f32.mxu1 %vm4561_vm0, %v4560_v0 }
 0x2dd   : > { %v3138_v47 = vpop.permute.xlu0 %3137  ;;  %v3140_v48 = vpop.permute.xlu1 %3139 }
 0x2de   : > { %4358 = vmatpush3.msk.msra.mxu1 %vm1990_vm10, %v3140_v48  ;;  %v3142_v56 = vsel %vm1590_vm8, %v3138_v47, %v3140_v48 }
 0x2df   : > { %4360 = vmatmul.mubr.msk.f32.vlgmr.msra.gmra.mrb[32].mxu1 %vm1986_vm11, %v4208_v46  ;;  %4362 = vmatprep.subr.mxu1 %v4560_v0 }
 0x2e0   : > { %4193 = vmatmul.mubr.msk.f32.vlgmr.msra.gmra.mrb[2].mxu0 %vm1986_vm11, %v4190_v30  ;;  %4364 = vmatprep.mubr.msk.f32.mxu1 %vm4561_vm0, %v4560_v0 }
 0x2e1   : > { %4198 = vmatpush1.msk.msra.mxu0 %vm1990_vm10, %v2805_v49  ;;  %v3136_v51 = vpop.permute.xlu0 %3135  ;;  %2880 = vmatprep.mubr.f32.mxu0 %v4560_v0  ;;  %v3306_v57 = vpop.permute.xlu1 %3305 }
 0x2e2   : > { %4203 = vmatprep.subr.msk.mxu0 %vm1990_vm10, %v2974_v50  ;;  %v3141_v58 = vsel %vm1590_vm8, %v3136_v51, %v3138_v47 }
 0x2e5   : > { %v3308_v54 = vpop.permute.xlu0 %3307  ;;  %v3304_v60 = vpop.permute.xlu1 %3303 }
 0x2e6   : > { %4363 = vmatpush3.msk.msra.mxu1 %vm1990_vm10, %v3308_v54  ;;  %v3310_v59 = vsel %vm1751_vm9, %v3306_v57, %v3308_v54  ;;  %v3309_v61 = vsel %vm1751_vm9, %v3304_v60, %v3306_v57 }
 0x2e7   : > { %4365 = vmatmul.mubr.msk.f32.vlgmr.msra.gmra.mrb[34].mxu1 %vm1986_vm11, %v4214_v52  ;;  %4367 = vmatprep.subr.mxu1 %v4560_v0 }
 0x2e8   : > { %4199 = vmatmul.mubr.msk.f32.vlgmr.msra.gmra.mrb[2].mxu0 %vm1986_vm11, %v4196_v34  ;;  %4369 = vmatprep.mubr.msk.f32.mxu1 %vm4561_vm0, %v4560_v0 }
 0x2e9   : > { %4204 = vmatpush1.msk.msra.mxu0 %vm1990_vm10, %v2973_v55  ;;  %3048 = vmatprep.mubr.f32.mxu0 %v4560_v0 }
 0x2ea   : > { %4209 = vmatprep.subr.msk.mxu0 %vm1990_vm10, %v3142_v56 }
 0x2f0   : > { %4205 = vmatmul.mubr.msk.f32.vlgmr.msra.gmra.mrb[2].mxu0 %vm1986_vm11, %v4202_v41 }
 0x2f1   : > { %4210 = vmatpush1.msk.msra.mxu0 %vm1990_vm10, %v3141_v58  ;;  %3216 = vmatprep.mubr.f32.mxu0 %v4560_v0 }
 0x2f2   : > { %4215 = vmatprep.subr.msk.mxu0 %vm1990_vm10, %v3310_v59 }
 0x2f6   : > { %v3468_v28 = vpop.permute.xlu0 %3467 }
 0x2f8   : > { %4211 = vmatmul.mubr.msk.f32.vlgmr.msra.gmra.mrb[2].mxu0 %vm1986_vm11, %v4208_v46 }
 0x2f9   : > { %4216 = vmatpush1.msk.msra.mxu0 %vm1990_vm10, %v3309_v61  ;;  %3384 = vmatprep.mubr.f32.mxu0 %v4560_v0 }
 0x2fa   : > { %v3509_v50 = vpop.permute.xlu0 %3508 }
 0x300   : > { %4217 = vmatmul.mubr.msk.f32.vlgmr.msra.gmra.mrb[2].mxu0 %vm1986_vm11, %v4214_v52 }
 0x301   : > { %3610 = vmatprep.mubr.f32.mxu0 %v4560_v0 }
 0x38f   : > { %v2134_v62 = vpop.f32.mrb[18].mxu1 }
 0x390   : > { %v4326_v63 = vpop.f32.mrb[19].mxu1 }
 0x394   : > { %v2284_v4 = vpop.f32.mrb[20].mxu1 }
 0x395   : > { %v2285_v5 = vadd.f32 %v2284_v4, %v2134_v62  ;;  %v4331_v6 = vpop.f32.mrb[21].mxu1 }
 0x398   : > { %v2449_v7 = vpop.f32.mrb[22].mxu1 }
 0x399   : > { %v2455_v8 = vadd.f32 %v2449_v7, %v2285_v5  ;;  %v4336_v9 = vpop.f32.mrb[23].mxu1  ;;  %v3522_v5 = vld [vmem:[%s5193_s6] sm:$0x3] }
 0x39c   : > { %v2617_v10 = vpop.f32.mrb[24].mxu1 }
 0x39d   : > { %v2623_v11 = vadd.f32 %v2617_v10, %v2455_v8  ;;  %v4341_v12 = vpop.f32.mrb[25].mxu1 }
 0x3a2   : > { %v2785_v13 = vpop.f32.mrb[26].mxu1 }
 0x3a3   : > { %v2791_v14 = vadd.f32 %v2785_v13, %v2623_v11  ;;  %v4346_v15 = vpop.f32.mrb[27].mxu1 }
 0x3a6   : > { %v2953_v16 = vpop.f32.mrb[28].mxu1 }
 0x3a7   : > { %v2959_v17 = vadd.f32 %v2953_v16, %v2791_v14  ;;  %v4351_v18 = vpop.f32.mrb[29].mxu1 }
 0x3a8   : > { %v3690_v18 = vld [vmem:[%s5195_s8] sm:$0xff] }
 0x3ae   : > { %v3121_v19 = vpop.f32.mrb[30].mxu1 }
 0x3af   : > { %v3127_v20 = vadd.f32 %v3121_v19, %v2959_v17  ;;  %v4356_v21 = vpop.f32.mrb[31].mxu1 }
 0x3b2   : > { %v3289_v22 = vpop.f32.mrb[32].mxu1 }
 0x3b3   : > { %v3295_v23 = vadd.f32 %v3289_v22, %v3127_v20  ;;  %v4361_v24 = vpop.f32.mrb[33].mxu1 }
 0x3ba   : > { %v3457_v25 = vpop.f32.mrb[34].mxu1 }
 0x3bb   : > { %v3463_v26 = vadd.f32 %v3457_v25, %v3295_v23  ;;  %v4366_v27 = vpop.f32.mrb[35].mxu1 }
 0x3bc   : > { %v3859_v27 = vld [vmem:[%s5197_s10] sm:$0x3] }
 0x3bd   : > { %v3472_v29 = vadd.f32 %v3468_v28, %v3463_v26 }
 0x3bf   : > { %v3475_v30 = vmul.f32 0.5, %v3472_v29 }
 0x3c1   : > { %4481 = vtanh.f32 %v3475_v30 }
 0x3cb   : > { %v4482_v31 = vpop.eup %4481 }
 0x3cc   : > { %v3481_v32 = vadd.f32 1.0, %v4482_v31 }
 0x3ce   : > { %v3484_v33 = vmul.f32 0.5, %v3481_v32  ;;  %v3860_v32 = vld [vmem:[%s5198_s11] sm:$0x3] }
 0x3d0   : > { %v5038_v34 = vmul.f32 %v3484_v33, %v3472_v29 }
 0x3d2   : > { %3498 = vrot.lane.b32.xlu1 %v5038_v34, %s5230_s28 }
 0x3d3   : > { %v3386_v35 = vpop.f32.mrb[2].mxu0 }
 0x3d4   : > { %v3470_v36 = vadd.f32 %v3468_v28, %v3386_v35  ;;  %v3388_v37 = vpop.f32.mrb[3].mxu0 }
 0x3d5   : > { %v3471_v38 = vadd.f32 %v3468_v28, %v3388_v37  ;;  %v3935_v37 = vld [vmem:[%s5199_s12] sm:$0xff] }
 0x3d6   : > { %v3473_v39 = vmul.f32 0.5, %v3470_v36 }
 0x3d7   : > { %v3474_v40 = vmul.f32 0.5, %v3471_v38 }
 0x3d8   : > { %4483 = vtanh.f32 %v3473_v39 }
 0x3d9   : > { %4485 = vtanh.f32 %v3474_v40 }
 0x3e2   : > { %v4484_v41 = vpop.eup %4483 }
 0x3e3   : > { %v4486_v42 = vpop.eup %4485  ;;  %v3479_v43 = vadd.f32 1.0, %v4484_v41 }
 0x3e4   : > { %v3480_v45 = vadd.f32 1.0, %v4486_v42  ;;  %v4493_v42 = vld [vmem:[%s4706_s18] sm:$0xff] }
 0x3e5   : > { %v3482_v46 = vmul.f32 0.5, %v3479_v43 }
 0x3e6   : > { %v3483_v47 = vmul.f32 0.5, %v3480_v45  ;;  %v4494_v45 = vld [vmem:[%s4706_s18 + $0x8] sm:$0xff] }
 0x3e7   : > { %v5042_v48 = vmul.f32 %v3482_v46, %v3470_v36 }
 0x3e8   : > { %v5044_v49 = vmul.f32 %v3483_v47, %v3471_v38  ;;  %v3936_v38 = vld [vmem:[%s5200_s13] sm:$0xff]  ;;  %v4495_v47 = vld [vmem:[%s4706_s18 + $0x10] sm:$0xff]  ;;  %s458_s18 = sand.u32 1, %s4550_s30  }
 0x3e9   : > { %3494 = vrot.lane.b32.xlu1 %v5042_v48, %s5230_s28  ;;  %s4063_s17 = scalar_lea.sflag [#allocation4], %s458_s18 }
 0x3ea   : > { %3496 = vrot.lane.b32.xlu0 %v5044_v49, %s5230_s28 }
 0x3ed   : > { %3510 = vrot.lane.b32.xlu1 %v4874_v44, %s5230_s28 }
 0x3ee   : > { %3512 = vrot.lane.b32.xlu0 %v4878_v53, %s5230_s28 }
 0x444   : > { %v3499_v51 = vpop.permute.xlu1 %3498 }
 0x45b   : > { %v5054_v52 = vpop.permute.xlu1 %3494 }
 0x45c   : > { %v3497_v54 = vpop.permute.xlu0 %3496  ;;  %v3505_v60 = vadd.f32 %v5054_v52, %v4712_v2  ;;  %v3691_v2 = vld [vmem:[%s5196_s9] sm:$0xff]  ;;  %v4033_v43 = vsub.f32 %v4493_v42, %v5054_v52 }
 0x45d   : > { %v5058_v55 = vsel %vm1959_vm13, %v5054_v52, %v3497_v54  ;;  %v5061_v56 = vsel %vm1959_vm13, %v3497_v54, %v3499_v51 }
 0x45e   : > { %v3506_v57 = vadd.f32 %v5058_v55, %v4709_v1  ;;  %v3507_v44 = vadd.f32 %v5061_v56, %v4719_v3  ;;  %v3519_v4 = vmul.f32 %v3509_v50, %v3505_v60  ;;  %v3523_v1 = vld [vmem:[%s5194_s7] sm:$0x3]  ;;  %v4034_v46 = vsub.f32 %v4494_v45, %v5058_v55 }
 0x45f   : > { %v3511_v58 = vpop.permute.xlu1 %3510 }
 0x460   : > { %v3514_v53 = vsel %vm1959_vm13, %v3509_v50, %v3511_v58  ;;  %v3513_v59 = vpop.permute.xlu0 %3512  ;;  %v4035_v50 = vsub.f32 %v4495_v47, %v5061_v56 }
 0x461   : > { %v3520_v61 = vmul.f32 %v3514_v53, %v3506_v57  ;;  %v3515_v62 = vsel %vm1959_vm13, %v3511_v58, %v3513_v59 }
 0x462   : > { %v3521_v63 = vmul.f32 %v3515_v62, %v3507_v44 }
 0x463   : > { %3534 = vrot.lane.b32.xlu1 %v3520_v61, %s5226_s25 }
 0x464   : > { %3536 = vrot.lane.b32.xlu0 %v3521_v63, %s5226_s25 }
 0x467   : > { %3532 = vrot.lane.b32.xlu1 %v3519_v4, %s5226_s25 }
 0x468   : > { %3526 = vperm.xlu0 %4473, %v3523_v1  }
 0x46c   : > { %3694 = vperm.xlu0 %4473, %v3691_v2  }
 0x4d5   : > { %v3535_v3 = vpop.permute.xlu1 %3534 }
 0x4d6   : > { %v3537_v6 = vpop.permute.xlu0 %3536 }
 0x4d7   : > { %4368 = vmatpush3.msra.mxu1 %v3537_v6  ;;  %v3539_v7 = vsel %vm1107_vm5, %v3535_v3, %v3537_v6  ;;  %v3854_v11 = vsel %vm3853_vm1, %v3537_v6, 0.0 }
 0x4d8   : > { %3546 = vmatprep.subr.mxu0 %v3539_v7  ;;  %4370 = vmatmul.mubr.msk.f32.vlgmr.msra.gmra.mrb[36].mxu1 %vm488_vm2, %v3522_v5 }
 0x4d9   : > { %v3533_v8 = vpop.permute.xlu1 %3532  ;;  %4372 = vmatprep.subr.mxu1 %v4560_v0  ;;  %4374 = vmatprep.mubr.msk.f32.mxu1 %vm4561_vm0, %v4560_v0 }
 0x4da   : > { %v3538_v9 = vsel %vm1107_vm5, %v3533_v8, %v3535_v3 }
 0x4db   : > { %v3852_v10 = vadd.f32 %v3539_v7, %v3538_v9  ;;  %3547 = vmatpush1.msra.mxu0 %v3538_v9 }
 0x4dc   : > { %4220 = vmatmul.mubr.msk.f32.vlgmr.msra.gmra.mrb[4].mxu0 %vm488_vm2, %v3522_v5 }
 0x4dd   : > { %v3855_v12 = vadd.f32 %v3854_v11, %v3852_v10  ;;  %3775 = vmatprep.mubr.f32.mxu0 %v4560_v0 }
 0x4df   : > { %3856 = vadd.xlane.f32.xlu1 %v3855_v12 }
 0x4e7   : > { %v3527_v13 = vpop.permute.xlu0 %3526 }
 0x4eb   : > { %v3695_v51 = vpop.permute.xlu0 %3694 }
 0x56c   : > { %v3857_v23 = vpop.xlane.xlu1 %3856 }
 0x56d   : > { %v3858_v26 = vmul.f32 0.00390625, %v3857_v23 }
 0x5ab   : > { %v3683_v14 = vpop.f32.mrb[36].mxu1 }
 0x5ac   : > { %v3684_v15 = vadd.f32 %v3683_v14, %v3527_v13  ;;  %v4371_v16 = vpop.f32.mrb[37].mxu1 }
 0x5ae   : > { %v3689_v17 = vmax.f32 %v3684_v15, 0.0 }
 0x5af   : > { %v3612_v19 = vpop.f32.mrb[4].mxu0 }
 0x5b0   : > { %v3613_v20 = vadd.f32 %v3612_v19, %v3527_v13  ;;  %v3614_v21 = vpop.f32.mrb[5].mxu0  ;;  %4373 = vmatpush3.msk.msra.mxu1 %vm3701_vm3, %v3689_v17 }
 0x5b1   : > { %v3615_v22 = vadd.f32 %v3614_v21, %v3527_v13  ;;  %4375 = vmatmul.mubr.msk.f32.vlgmr.msra.gmra.mrb[38].mxu1 %vm3697_vm4, %v3690_v18  ;;  %4382 = vmatprep.subr.mxu1 %v4560_v0 }
 0x5b2   : > { %4384 = vmatprep.mubr.msk.f32.mxu1 %vm4561_vm0, %v4560_v0  ;;  %v3687_v25 = vmax.f32 %v3613_v20, 0.0 }
 0x5b3   : > { %v3688_v24 = vmax.f32 %v3615_v22, 0.0 }
 0x5b5   : > { %4222 = vmatprep.subr.msk.mxu0 %vm3701_vm3, %v3688_v24 }
 0x5b6   : > { %4223 = vmatpush1.msk.msra.mxu0 %vm3701_vm3, %v3687_v25 }
 0x5b7   : > { %4224 = vmatmul.mubr.msk.f32.vlgmr.msra.gmra.mrb[6].mxu0 %vm3697_vm4, %v3690_v18  ;;  %4377 = vmatprep.subr.mxu0 %v4560_v0 }
 0x5b8   : > { %4378 = vmatpush3.msra.mxu0 %v3858_v26  ;;  %4379 = vmatprep.mubr.msk.f32.mxu0 %vm4561_vm0, %v4560_v0 }
 0x5bb   : > { %4380 = vmatmul.mubr.msk.f32.vlgmr.msra.gmra.mrb[8].mxu0 %vm488_vm2, %v3859_v27 }
 0x684   : > { %v3848_v28 = vpop.f32.mrb[38].mxu1 }
 0x685   : > { %v4376_v29 = vpop.f32.mrb[39].mxu1  ;;  %v3849_v54 = vadd.f32 %v3848_v28, %v3695_v51 }
 0x68a   : > { %v3777_v30 = vpop.f32.mrb[6].mxu0 }
 0x68b   : > { %v3779_v31 = vpop.f32.mrb[7].mxu0  ;;  %v3778_v57 = vadd.f32 %v3777_v30, %v3695_v51 }
 0x68c   : > { %v3780_v58 = vadd.f32 %v3779_v31, %v3695_v51 }
 0x68e   : > { %v3930_v33 = vpop.f32.mrb[8].mxu0 }
 0x68f   : > { %v3931_v35 = vadd.f32 %v3930_v33, %v3860_v32  ;;  %v4381_v36 = vpop.f32.mrb[9].mxu0 }
 0x691   : > { %v3934_v0 = vmax.f32 %v3931_v35, 0.0 }
 0x693   : > { %4383 = vmatpush3.msk.msra.mxu1 %vm3701_vm3, %v3934_v0 }
 0x694   : > { %4385 = vmatmul.mubr.msk.f32.vlgmr.msra.gmra.mrb[40].mxu1 %vm3697_vm4, %v3935_v37 }
 0x767   : > { %v4009_v39 = vpop.f32.mrb[40].mxu1 }
 0x768   : > { %v4010_v40 = vadd.f32 %v4009_v39, %v3936_v38  ;;  %v4386_v41 = vpop.f32.mrb[41].mxu1 }
 0x76a   : > { %4015 = vperm.xlu0 %4473, %v4010_v40  }
 0x76e   : > { %4039 = vrot.lane.b32.xlu0 %v4033_v43, %s5226_s25 }
 0x772   : > { %4041 = vrot.lane.b32.xlu0 %v4034_v46, %s5226_s25 }
 0x776   : > { %4043 = vrot.lane.b32.xlu0 %v4035_v50, %s5226_s25  ;;  %s4419_s25 = smul.u32 24, %s458_s18 }
 0x778   : > { %s460_s0 = scalar_lea.vmem [#allocation3], %s4419_s25 }
 0x779   : > { %s4077_s28 = sshll.u32 %s460_s0, 4  ;;  %s5144_s28 = int_to_ptr.vmem [resolvable:$true] %s4077_s28 }
 0x77a   : > { %s4496_s25 = scalar_lea.vmem %s5144_s28, 384  ;;  %p4503_p0 = scmp.lt.s32.totalorder %s5144_s28, %s4501_s2 }
 0x77b   : > { %p4497_p11 = scmp.ne.s32.totalorder %s5144_s28, %s4496_s25  ;;  %p4504_p1 = scmp.lt.s32.totalorder %s4502_s21, %s4496_s25 }
 0x77d   : > { %p4498_p12 = pnand %p4497_p11, %p4686_p5  ;;  %p4505_p2 = por %p4504_p1, %p4503_p0 }
 0x77f   : > { %p4499_p13 = pneg %p4498_p12 }
 0x781   : > { %p4506_p3 = pnand %p4505_p2, %p4499_p13 }
 0x7e9   : > { %v4016_v44 = vpop.permute.xlu0 %4015 }
 0x7ea   : > { %v4018_v52 = vadd.f32 %v4016_v44, %v3778_v57  ;;  %v4019_v53 = vadd.f32 %v4016_v44, %v3780_v58  ;;  %v4020_v59 = vadd.f32 %v4016_v44, %v3849_v54 }
 0x7ec   : > { %v4021_v60 = vmul.f32 0.5, %v4018_v52  ;;  %v4022_v61 = vmul.f32 0.5, %v4019_v53  ;;  %v4023_v55 = vmul.f32 0.5, %v4020_v59 }
 0x7ed   : > { %v4040_v62 = vpop.permute.xlu0 %4039 }
 0x7ee   : > { %4487 = vtanh.f32 %v4021_v60 }
 0x7ef   : > { %4489 = vtanh.f32 %v4022_v61 }
 0x7f0   : > { %4491 = vtanh.f32 %v4023_v55 }
 0x7f1   : > { %v4042_v56 = vpop.permute.xlu0 %4041 }
 0x7f2   : > { %v4045_v8 = vsel %vm1107_vm5, %v4040_v62, %v4042_v56 }
 0x7f5   : > { %v4044_v3 = vpop.permute.xlu0 %4043 }
 0x7f6   : > { %v4046_v12 = vsel %vm1107_vm5, %v4042_v56, %v4044_v3 }
 0x7f8   : > { %v4488_v63 = vpop.eup %4487 }
 0x7f9   : > { %v4490_v4 = vpop.eup %4489  ;;  %v4027_v1 = vadd.f32 1.0, %v4488_v63 }
 0x7fa   : > { %v4492_v2 = vpop.eup %4491  ;;  %v4028_v5 = vadd.f32 1.0, %v4490_v4 }
 0x7fb   : > { %v4030_v6 = vmul.f32 0.5, %v4027_v1  ;;  %v4029_v7 = vadd.f32 1.0, %v4492_v2 }
 0x7fc   : > { %v4031_v9 = vmul.f32 0.5, %v4028_v5 }
 0x7fd   : > { %v4050_v10 = vmul.f32 %v4045_v8, %v4030_v6  ;;  %v4032_v11 = vmul.f32 0.5, %v4029_v7 }
 0x7fe   : > { %v4051_v13 = vmul.f32 %v4046_v12, %v4031_v9 }
 0x7ff   : > { %v4053_v14 = vadd.f32 %v4050_v10, %v5042_v48  ;;  %v4052_v15 = vmul.f32 %v4044_v3, %v4032_v11 }
 0x800   : > { %v4054_v16 = vadd.f32 %v4051_v13, %v5044_v49 }
 0x801   : > { %v4056_v17 = vmul.f32 2.0, %v4053_v14  ;;  %v4055_v18 = vadd.f32 %v4052_v15, %v5038_v34 }
 0x802   : > { %v4057_v19 = vmul.f32 2.0, %v4054_v16 }
 0x803   : > { %4059 = vst [vmem:[%s460_s0] sm:$0xff] %v4056_v17  ;;  %v4058_v20 = vmul.f32 2.0, %v4055_v18 }
 0x804   : > { %4060 = vst [vmem:[%s460_s0 + $0x8] sm:$0xff] %v4057_v19 }
 0x805   : > { %4061 = vst.msk [vmem:[%s460_s0 + $0x10] sm:$0xff] %vm3853_vm1, %v4058_v20 }
 0x806   : > { %4509 = shalt.err (!%p4506_p3)
}
 0x807   : > { %s4510_s18 = scalar_lea.hbm %s5142_s20, 384  ;;  %s4514_s1 = scalar_lea.hbm %s5201_s14, 768 }
 0x808   : > { %p4511_p4 = scmp.ne.s32.totalorder %s5142_s20, %s4510_s18  ;;  %p4515_p9 = scmp.lt.u32.totalorder %s5142_s20, %s5201_s14 }
 0x809   : > { %p4516_p10 = scmp.lt.u32.totalorder %s4514_s1, %s4510_s18  ;;  %p4518_p12 = scmp.lt.u32.totalorder %s4510_s18, %s5142_s20 }
 0x80a   : > { %p4512_p7 = pnand %p4511_p4, %p4686_p5 }
 0x80b   : > { %p4517_p11 = por %p4516_p10, %p4515_p9 }
 0x80c   : > { %p4513_p8 = pneg %p4512_p7 }
 0x80d   : > { %p4519_p13 = por %p4518_p12, %p4517_p11 }
 0x80f   : > { %p4520_p0 = pnand %p4519_p13, %p4513_p8 }
 0x811   : > { %4523 = shalt.err (!%p4520_p0)
}
 0x812   : > { %4422 = dma.vmem_to_hbm [thread:$0]  (%p4686_p5), %s5144_s28, 384, %s5142_s20, %s4063_s17  }
 0x813 PF: > { %p4428_p1 = scmp.ge.s32.totalorder %s4558_s16, 2  ;;  %s4089_s25 = sand.u32 1, %s4546_s29  }
 0x814   : > { %s4090_s21 = scalar_lea.sflag [#allocation4], %s4089_s25 }
 0x815   : > { %p4425_p2 = pnand %p4428_p1, %p4690_p6 }
 0x817   : > { %4541 = dma.done.wait (!%p4425_p2), %s4090_s21, 384  }
 0x818   : > { %4543 = vsyncadd (!%p4425_p2), %s4090_s21, 4294966912  ;;  %p24_p3 = scmp.ge.s32.totalorder %s4673_s19, 4   ;;  %s5231_s29 = smov %s4550_s30 }
 0x819   : > { %s5232_s30 = smov %s4554_s15  ;;  %s5233_s15 = smov %s4684_s22 }
 0x81a   : > { %s5234_s16 = smov %s4673_s19  ;;  %26 = sbr.rel (!%p24_p3) target bundleno = 7 (0x7), region = 127 }
 0x821   :  { %4095 = vsyncpa [#allocation4], 1 }
 0x822   :  { %4097 = vsyncpa [#allocation4 + $0x1], 1 }

</bundles_post_ra>
